<compile_context>
chip_gen: v7x
topology: tpu7x:2x2x1
jax: 0.10.0
libtpu: 0.0.40
codegen_flags: <defaults>
</compile_context>

<pallas_src>
import math

import jax
import jax.numpy as jnp
from jax import lax
from jax.experimental import pallas as pl
from jax.experimental.pallas import tpu as pltpu

# ---- logical model hyperparameters (small, deterministic synthetic transformer) ----
B = 2           # batch
S = 8           # sequence length
D = 32          # hidden size
H = 4           # attention heads
HD = D // H     # head dim
F = 64          # FFN inner size
V = 64          # vocab size
PAD_IDX = 0
LN_EPS = 1e-5

# ---- lane-padded sizes (TPU lane width = 128) ----
DP = 128        # padded hidden
FP = 128        # padded FFN inner
VP = 128        # padded vocab
BS = B * S      # fused batch*seq rows (16 -> two full sublane groups)

# rows of the packed bias / LayerNorm-vector array (each row is (1, 128), zero padded)
ROW_BQ, ROW_BK, ROW_BV, ROW_BO = 0, 1, 2, 3
ROW_G1, ROW_B1 = 4, 5
ROW_BF1, ROW_BF2 = 6, 7
ROW_G2, ROW_B2 = 8, 9
ROW_BLM = 10
N_VEC_ROWS = 16  # pad to a multiple of 8 sublanes


# --------------------------- Pallas kernel ---------------------------------
def encoder_lm_kernel(ids2d_ref, idscol_ref, tok_ref, pos_ref, wqkv_ref,
                      wo_ref, w1_ref, w2_ref, wlm_ref, vecs_ref, out_ref):
    f32 = jnp.float32
    vecs = vecs_ref[...]                                   # (16, 128) packed biases / LN vecs
    wo = wo_ref[...]                                       # (D, DP)

    # ---- fused embedding lookup: one-hot(ids) @ tok_emb on the MXU (no XLA gather) ----
    iota_v = lax.broadcasted_iota(jnp.int32, (BS, VP), 1)
    onehot = (iota_v == idscol_ref[...]).astype(f32)       # (BS, VP)
    x = jnp.dot(onehot, tok_ref[...], preferred_element_type=f32)   # (BS, DP)
    x = x + pos_ref[...]                                   # pos_emb pre-tiled to (BS, DP)

    # ---- key-padding mask -> additive attention bias, built ONCE (not per head) ----
    ids2d = ids2d_ref[...]                                 # (B, S) int32
    nb = jnp.where(ids2d != PAD_IDX, 0.0, -1e9).astype(f32)          # (B, S)
    nb_qk = jnp.broadcast_to(nb[:, None, :], (B, S, S))              # (B, Sq, Sk)

    # ---- fused QKV projection: one (BS, DP) @ (DP, 3*DP) matmul ----
    qkv = jnp.dot(x, wqkv_ref[...], preferred_element_type=f32)      # (BS, 3*DP)
    scale = 1.0 / math.sqrt(HD)
    q = (qkv[:, 0:DP] + vecs[ROW_BQ:ROW_BQ + 1, :]) * scale          # fold scale into q
    k = qkv[:, DP:2 * DP] + vecs[ROW_BK:ROW_BK + 1, :]
    v = qkv[:, 2 * DP:3 * DP] + vecs[ROW_BV:ROW_BV + 1, :]
    q3 = q.reshape(B, S, DP)                               # cheap: S == native sublane count
    k3 = k.reshape(B, S, DP)
    v3 = v.reshape(B, S, DP)

    # ---- multi-head attention: each head's score/context dots are batched over B,
    #      head outputs fold straight into Wo row-blocks (no lane concatenate) ----
    head_sum = jnp.zeros((BS, DP), f32)
    for h in range(H):                                     # static unroll, H = 4
        lo = h * HD
        qh = q3[:, :, lo:lo + HD]                          # (B, S, HD)
        kh = k3[:, :, lo:lo + HD]
        vh = v3[:, :, lo:lo + HD]
        s = jnp.einsum('bqd,bkd->bqk', qh, kh, preferred_element_type=f32)   # (B, S, S)
        s = s + nb_qk                                      # mask out padded keys
        s = s - jnp.max(s, axis=-1, keepdims=True)
        p = jnp.exp(s)
        p = p * pl.reciprocal(jnp.sum(p, axis=-1, keepdims=True), approx=True)
        ctx = jnp.einsum('bqk,bkd->bqd', p, vh, preferred_element_type=f32)  # (B, S, HD)
        head_sum = head_sum + jnp.dot(ctx.reshape(BS, HD), wo[lo:lo + HD, :],
                                      preferred_element_type=f32)            # (BS, DP)
    attn = head_sum + vecs[ROW_BO:ROW_BO + 1, :]

    def layernorm(z, g, b):
        # lanes [D:DP) of z are exactly zero; normalize over the *valid* width D so the
        # padded representation is numerically identical to the unpadded LayerNorm, and
        # g/b are zero in the padded lanes so those lanes stay zero.
        mu = jnp.sum(z, axis=-1, keepdims=True) * (1.0 / D)
        ex2 = jnp.sum(z * z, axis=-1, keepdims=True) * (1.0 / D)
        var = ex2 - mu * mu
        return (z - mu) * lax.rsqrt(var + LN_EPS) * g + b

    h1 = layernorm(x + attn, vecs[ROW_G1:ROW_G1 + 1, :], vecs[ROW_B1:ROW_B1 + 1, :])

    ff = jnp.dot(h1, w1_ref[...], preferred_element_type=f32) + vecs[ROW_BF1:ROW_BF1 + 1, :]
    # TODO(synk): PyTorch nn.GELU defaults to exact erf; tanh approximation kept here.
    ff = jax.nn.gelu(ff)
    ff = jnp.dot(ff, w2_ref[...], preferred_element_type=f32) + vecs[ROW_BF2:ROW_BF2 + 1, :]

    h2 = layernorm(h1 + ff, vecs[ROW_G2:ROW_G2 + 1, :], vecs[ROW_B2:ROW_B2 + 1, :])

    logits = jnp.dot(h2, wlm_ref[...], preferred_element_type=f32) + vecs[ROW_BLM:ROW_BLM + 1, :]
    out_ref[...] = logits.reshape(B, S, VP)                # lane-dense (last dim 128) store


# --------------------------- wrapper ----------------------------------------
@jax.jit
def custom_transformer_forward(input_ids, params):
    """Equivalent of CustomTransformerModel.forward(input_ids)."""
    ids2d = input_ids.astype(jnp.int32)        # (B, S)  -> in-kernel key-padding mask
    ids_col = ids2d.reshape(BS, 1)             # (BS, 1) -> in-kernel one-hot embedding rows

    vmem = lambda: pl.BlockSpec(memory_space=pltpu.MemorySpace.VMEM)
    logits_padded = pl.pallas_call(
        encoder_lm_kernel,
        out_shape=jax.ShapeDtypeStruct((B, S, VP), jnp.float32),
        in_specs=[vmem() for _ in range(10)],
        out_specs=vmem(),
    )(ids2d, ids_col,
      params["tok_emb"], params["pos_emb"], params["wqkv"], params["wo"],
      params["w1"], params["w2"], params["wlm"], params["vecs"])

    return logits_padded[..., :V]              # drop vocab lane padding -> (B, S, V)


# --------------------------- deterministic params ---------------------------
def init_params(key):
    ks = jax.random.split(key, 16)

    def dense(k, shape, scale):
        return jax.random.normal(k, shape, jnp.float32) * scale

    raw = {
        "tok_emb": dense(ks[0], (V, D), 0.02),
        "pos_emb": dense(ks[1], (S, D), 0.02),
        "wq": dense(ks[2], (D, D), 0.05), "bq": jnp.zeros((D,), jnp.float32),
        "wk": dense(ks[3], (D, D), 0.05), "bk": jnp.zeros((D,), jnp.float32),
        "wv": dense(ks[4], (D, D), 0.05), "bv": jnp.zeros((D,), jnp.float32),
        "wo": dense(ks[5], (D, D), 0.05), "bo": jnp.zeros((D,), jnp.float32),
        "g1": jnp.ones((D,), jnp.float32), "b1": jnp.zeros((D,), jnp.float32),
        "w1": dense(ks[6], (D, F), 0.05), "bf1": jnp.zeros((F,), jnp.float32),
        "w2": dense(ks[7], (F, D), 0.05), "bf2": jnp.zeros((D,), jnp.float32),
        "g2": jnp.ones((D,), jnp.float32), "b2": jnp.zeros((D,), jnp.float32),
        "wlm": dense(ks[8], (D, V), 0.05), "blm": jnp.zeros((V,), jnp.float32),
    }

    # ---- lane-padded / packed kernel parameters (all padding done once on the host) ----
    def pad2(w, rows, cols):
        return jnp.zeros((rows, cols), jnp.float32).at[:w.shape[0], :w.shape[1]].set(w)

    tok_p = pad2(raw["tok_emb"], VP, DP)                       # (VP, DP)
    pos_p = jnp.tile(pad2(raw["pos_emb"], S, DP), (B, 1))      # (BS, DP), pre-tiled over batch

    wqkv = jnp.zeros((DP, 3 * DP), jnp.float32)
    wqkv = wqkv.at[:D, 0:D].set(raw["wq"])
    wqkv = wqkv.at[:D, DP:DP + D].set(raw["wk"])
    wqkv = wqkv.at[:D, 2 * DP:2 * DP + D].set(raw["wv"])

    wo_p = pad2(raw["wo"], D, DP)                              # (D, DP): rows sliced per head
    w1_p = pad2(raw["w1"], DP, FP)
    w2_p = pad2(raw["w2"], FP, DP)
    wlm_p = pad2(raw["wlm"], DP, VP)

    vecs = jnp.zeros((N_VEC_ROWS, 128), jnp.float32)

    def setrow(arr, row, vec):
        return arr.at[row, :vec.shape[0]].set(vec)

    vecs = setrow(vecs, ROW_BQ, raw["bq"]); vecs = setrow(vecs, ROW_BK, raw["bk"])
    vecs = setrow(vecs, ROW_BV, raw["bv"]); vecs = setrow(vecs, ROW_BO, raw["bo"])
    vecs = setrow(vecs, ROW_G1, raw["g1"]); vecs = setrow(vecs, ROW_B1, raw["b1"])
    vecs = setrow(vecs, ROW_BF1, raw["bf1"]); vecs = setrow(vecs, ROW_BF2, raw["bf2"])
    vecs = setrow(vecs, ROW_G2, raw["g2"]); vecs = setrow(vecs, ROW_B2, raw["b2"])
    vecs = setrow(vecs, ROW_BLM, raw["blm"])

    kernel_params = {"tok_emb": tok_p, "pos_emb": pos_p, "wqkv": wqkv, "wo": wo_p,
                     "w1": w1_p, "w2": w2_p, "wlm": wlm_p, "vecs": vecs}
    return kernel_params, raw


# --------------------------- pure-JAX reference (unpadded) -------------------
def reference_forward(input_ids, raw):
    mask = input_ids != PAD_IDX                                     # (B, S)
    x = raw["tok_emb"][input_ids] + raw["pos_emb"][None]            # (B, S, D)

    def proj(z, w, b):
        return jnp.einsum('bsd,de->bse', z, w) + b

    q = proj(x, raw["wq"], raw["bq"]).reshape(B, S, H, HD).transpose(0, 2, 1, 3)
    k = proj(x, raw["wk"], raw["bk"]).reshape(B, S, H, HD).transpose(0, 2, 1, 3)
    v = proj(x, raw["wv"], raw["bv"]).reshape(B, S, H, HD).transpose(0, 2, 1, 3)
    s = jnp.einsum('bhqd,bhkd->bhqk', q, k) / math.sqrt(HD)
    s = s + jnp.where(mask, 0.0, -1e9)[:, None, None, :]
    p = jax.nn.softmax(s, axis=-1)
    ctx = jnp.einsum('bhqk,bhkd->bhqd', p, v).transpose(0, 2, 1, 3).reshape(B, S, D)
    attn = jnp.einsum('bsd,de->bse', ctx, raw["wo"]) + raw["bo"]

    def ln(z, g, b):
        mu = jnp.mean(z, axis=-1, keepdims=True)
        var = jnp.mean((z - mu) ** 2, axis=-1, keepdims=True)
        return (z - mu) * lax.rsqrt(var + LN_EPS) * g + b

    h1 = ln(x + attn, raw["g1"], raw["b1"])
    ff = jax.nn.gelu(jnp.einsum('bsd,df->bsf', h1, raw["w1"]) + raw["bf1"])
    ff = jnp.einsum('bsf,fd->bsd', ff, raw["w2"]) + raw["bf2"]
    h2 = ln(h1 + ff, raw["g2"], raw["b2"])
    return jnp.einsum('bsd,dv->bsv', h2, raw["wlm"]) + raw["blm"]


if __name__ == "__main__":
    key = jax.random.PRNGKey(0)
    pkey, ikey = jax.random.split(key)
    kernel_params, raw_params = init_params(pkey)

    # deterministic input ids in [1, V); pad the tail of each sequence with PAD_IDX
    input_ids = jax.random.randint(ikey, (B, S), 1, V, dtype=jnp.int32)
    input_ids = input_ids.at[:, -2:].set(PAD_IDX)   # exercise the attention-mask path

    logits = custom_transformer_forward(input_ids, kernel_params)
    jax.block_until_ready(logits)

    assert logits.shape == (B, S, V)
    assert bool(jnp.all(jnp.isfinite(logits)))

    ref = reference_forward(input_ids, raw_params)
    max_err = float(jnp.max(jnp.abs(logits - ref)))
    assert max_err < 3e-2, f"kernel/reference mismatch: max abs err {max_err}"
    print("KERNEL_OK")
</pallas_src>

<mosaic_0001>
module attributes {stable_mosaic.version = 11 : i64} {
  func.func @encoder_lm_kernel(%arg0: memref<2x8xi32, #tpu.memory_space<vmem>>, %arg1: memref<16x1xi32, #tpu.memory_space<vmem>>, %arg2: memref<128x128xf32, #tpu.memory_space<vmem>>, %arg3: memref<16x128xf32, #tpu.memory_space<vmem>>, %arg4: memref<128x384xf32, #tpu.memory_space<vmem>>, %arg5: memref<32x128xf32, #tpu.memory_space<vmem>>, %arg6: memref<128x128xf32, #tpu.memory_space<vmem>>, %arg7: memref<128x128xf32, #tpu.memory_space<vmem>>, %arg8: memref<128x128xf32, #tpu.memory_space<vmem>>, %arg9: memref<16x128xf32, #tpu.memory_space<vmem>>, %arg10: memref<2x8x128xf32, #tpu.memory_space<vmem>>) attributes {dimension_semantics = [], scalar_prefetch = 0 : i64, scratch_operands = 0 : i64, tpu.core_type = #tpu.core_type<tc>} {
    %c0 = arith.constant 0 : index
    %c0_0 = arith.constant 0 : index
    %0 = vector.load %arg9[%c0, %c0_0] : memref<16x128xf32, #tpu.memory_space<vmem>>, vector<16x128xf32>
    %c0_1 = arith.constant 0 : index
    %c0_2 = arith.constant 0 : index
    %1 = vector.load %arg5[%c0_1, %c0_2] : memref<32x128xf32, #tpu.memory_space<vmem>>, vector<32x128xf32>
    %2 = tpu.iota {dimensions = array<i32: 1>} : vector<16x128xi32>
    %c0_3 = arith.constant 0 : index
    %c0_4 = arith.constant 0 : index
    %3 = vector.load %arg1[%c0_3, %c0_4] : memref<16x1xi32, #tpu.memory_space<vmem>>, vector<16x1xi32>
    %4 = vector.broadcast %3 : vector<16x1xi32> to vector<16x128xi32>
    %5 = arith.cmpi eq, %2, %4 : vector<16x128xi32>
    %6 = arith.extui %5 : vector<16x128xi1> to vector<16x128xi32>
    %7 = arith.sitofp %6 : vector<16x128xi32> to vector<16x128xf32>
    %c0_5 = arith.constant 0 : index
    %c0_6 = arith.constant 0 : index
    %8 = vector.load %arg2[%c0_5, %c0_6] : memref<128x128xf32, #tpu.memory_space<vmem>>, vector<128x128xf32>
    %cst = arith.constant dense<0.000000e+00> : vector<16x128xf32>
    %9 = tpu.matmul %7, %8, %cst {dimension_numbers = #tpu.dot_dimension_numbers<[1], [0], [0], [1], [0, 0, 1, 1], [], []>} : vector<16x128xf32>, vector<128x128xf32>, vector<16x128xf32> -> vector<16x128xf32>
    %c0_7 = arith.constant 0 : index
    %c0_8 = arith.constant 0 : index
    %10 = vector.load %arg3[%c0_7, %c0_8] : memref<16x128xf32, #tpu.memory_space<vmem>>, vector<16x128xf32>
    %11 = arith.addf %9, %10 : vector<16x128xf32>
    %c0_9 = arith.constant 0 : index
    %c0_10 = arith.constant 0 : index
    %12 = vector.load %arg0[%c0_9, %c0_10] : memref<2x8xi32, #tpu.memory_space<vmem>>, vector<2x8xi32>
    %c0_i32 = arith.constant 0 : i32
    %13 = vector.broadcast %c0_i32 : i32 to vector<2x8xi32>
    %14 = arith.cmpi ne, %12, %13 : vector<2x8xi32>
    %cst_11 = arith.constant 0.000000e+00 : f32
    %cst_12 = arith.constant -1.000000e+09 : f32
    %15 = vector.broadcast %cst_11 : f32 to vector<2x8xf32>
    %16 = vector.broadcast %cst_12 : f32 to vector<2x8xf32>
    %17 = arith.select %14, %15, %16 : vector<2x8xi1>, vector<2x8xf32>
    %18 = vector.shape_cast %17 : vector<2x8xf32> to vector<2x1x8xf32>
    %19 = vector.shape_cast %18 : vector<2x1x8xf32> to vector<2x1x8xf32>
    %20 = vector.broadcast %19 : vector<2x1x8xf32> to vector<2x8x8xf32>
    %c0_13 = arith.constant 0 : index
    %c0_14 = arith.constant 0 : index
    %21 = vector.load %arg4[%c0_13, %c0_14] : memref<128x384xf32, #tpu.memory_space<vmem>>, vector<128x384xf32>
    %cst_15 = arith.constant dense<0.000000e+00> : vector<16x384xf32>
    %22 = tpu.matmul %11, %21, %cst_15 {dimension_numbers = #tpu.dot_dimension_numbers<[1], [0], [0], [1], [0, 0, 1, 1], [], []>} : vector<16x128xf32>, vector<128x384xf32>, vector<16x384xf32> -> vector<16x384xf32>
    %23 = vector.extract_strided_slice %22 {offsets = [0, 0], sizes = [16, 128], strides = [1, 1]} : vector<16x384xf32> to vector<16x128xf32>
    %24 = vector.extract_strided_slice %0 {offsets = [0, 0], sizes = [1, 128], strides = [1, 1]} : vector<16x128xf32> to vector<1x128xf32>
    %25 = vector.broadcast %24 : vector<1x128xf32> to vector<16x128xf32>
    %26 = arith.addf %23, %25 : vector<16x128xf32>
    %cst_16 = arith.constant 0.353553385 : f32
    %27 = vector.broadcast %cst_16 : f32 to vector<16x128xf32>
    %28 = arith.mulf %26, %27 : vector<16x128xf32>
    %29 = vector.extract_strided_slice %22 {offsets = [0, 128], sizes = [16, 128], strides = [1, 1]} : vector<16x384xf32> to vector<16x128xf32>
    %30 = vector.extract_strided_slice %0 {offsets = [1, 0], sizes = [1, 128], strides = [1, 1]} : vector<16x128xf32> to vector<1x128xf32>
    %31 = vector.broadcast %30 : vector<1x128xf32> to vector<16x128xf32>
    %32 = arith.addf %29, %31 : vector<16x128xf32>
    %33 = vector.extract_strided_slice %22 {offsets = [0, 256], sizes = [16, 128], strides = [1, 1]} : vector<16x384xf32> to vector<16x128xf32>
    %34 = vector.extract_strided_slice %0 {offsets = [2, 0], sizes = [1, 128], strides = [1, 1]} : vector<16x128xf32> to vector<1x128xf32>
    %35 = vector.broadcast %34 : vector<1x128xf32> to vector<16x128xf32>
    %36 = arith.addf %33, %35 : vector<16x128xf32>
    %37 = vector.shape_cast %28 : vector<16x128xf32> to vector<2x8x128xf32>
    %38 = vector.shape_cast %32 : vector<16x128xf32> to vector<2x8x128xf32>
    %39 = vector.shape_cast %36 : vector<16x128xf32> to vector<2x8x128xf32>
    %cst_17 = arith.constant 0.000000e+00 : f32
    %40 = vector.broadcast %cst_17 : f32 to vector<16x128xf32>
    %41 = vector.extract_strided_slice %37 {offsets = [0, 0, 0], sizes = [2, 8, 8], strides = [1, 1, 1]} : vector<2x8x128xf32> to vector<2x8x8xf32>
    %42 = vector.extract_strided_slice %38 {offsets = [0, 0, 0], sizes = [2, 8, 8], strides = [1, 1, 1]} : vector<2x8x128xf32> to vector<2x8x8xf32>
    %43 = vector.extract_strided_slice %39 {offsets = [0, 0, 0], sizes = [2, 8, 8], strides = [1, 1, 1]} : vector<2x8x128xf32> to vector<2x8x8xf32>
    "tpu.trace_start"() <{level = 10 : i32, message = "bqd,bkd->bqk"}> : () -> ()
    %cst_18 = arith.constant dense<0.000000e+00> : vector<2x8x8xf32>
    %44 = tpu.matmul %41, %42, %cst_18 {dimension_numbers = #tpu.dot_dimension_numbers<[2], [2], [1], [1], [0, 0, 0, 1, 1, 1], [0], [0]>} : vector<2x8x8xf32>, vector<2x8x8xf32>, vector<2x8x8xf32> -> vector<2x8x8xf32>
    "tpu.trace_stop"() : () -> ()
    %45 = arith.addf %44, %20 : vector<2x8x8xf32>
    %cst_19 = arith.constant dense<0xFF800000> : vector<2x8xf32>
    %46 = vector.multi_reduction <maximumf>, %45, %cst_19 [2] : vector<2x8x8xf32> to vector<2x8xf32>
    %47 = vector.shape_cast %46 : vector<2x8xf32> to vector<2x8x1xf32>
    %48 = vector.broadcast %47 : vector<2x8x1xf32> to vector<2x8x8xf32>
    %49 = arith.subf %45, %48 : vector<2x8x8xf32>
    %50 = math.exp %49 : vector<2x8x8xf32>
    %cst_20 = arith.constant dense<0.000000e+00> : vector<2x8xf32>
    %51 = vector.multi_reduction <add>, %50, %cst_20 [2] : vector<2x8x8xf32> to vector<2x8xf32>
    %52 = vector.shape_cast %51 : vector<2x8xf32> to vector<2x8x1xf32>
    %53 = tpu.reciprocal %52 {approx = true} : vector<2x8x1xf32> -> vector<2x8x1xf32>
    %54 = vector.broadcast %53 : vector<2x8x1xf32> to vector<2x8x8xf32>
    %55 = arith.mulf %50, %54 : vector<2x8x8xf32>
    "tpu.trace_start"() <{level = 10 : i32, message = "bqk,bkd->bqd"}> : () -> ()
    %cst_21 = arith.constant dense<0.000000e+00> : vector<2x8x8xf32>
    %56 = tpu.matmul %55, %43, %cst_21 {dimension_numbers = #tpu.dot_dimension_numbers<[2], [1], [1], [2], [0, 0, 0, 1, 1, 2], [0], [0]>} : vector<2x8x8xf32>, vector<2x8x8xf32>, vector<2x8x8xf32> -> vector<2x8x8xf32>
    "tpu.trace_stop"() : () -> ()
    %57 = vector.shape_cast %56 : vector<2x8x8xf32> to vector<16x8xf32>
    %58 = vector.extract_strided_slice %1 {offsets = [0, 0], sizes = [8, 128], strides = [1, 1]} : vector<32x128xf32> to vector<8x128xf32>
    %cst_22 = arith.constant dense<0.000000e+00> : vector<16x128xf32>
    %59 = tpu.matmul %57, %58, %cst_22 {dimension_numbers = #tpu.dot_dimension_numbers<[1], [0], [0], [1], [0, 0, 1, 1], [], []>} : vector<16x8xf32>, vector<8x128xf32>, vector<16x128xf32> -> vector<16x128xf32>
    %60 = arith.addf %40, %59 : vector<16x128xf32>
    %61 = vector.extract_strided_slice %37 {offsets = [0, 0, 8], sizes = [2, 8, 8], strides = [1, 1, 1]} : vector<2x8x128xf32> to vector<2x8x8xf32>
    %62 = vector.extract_strided_slice %38 {offsets = [0, 0, 8], sizes = [2, 8, 8], strides = [1, 1, 1]} : vector<2x8x128xf32> to vector<2x8x8xf32>
    %63 = vector.extract_strided_slice %39 {offsets = [0, 0, 8], sizes = [2, 8, 8], strides = [1, 1, 1]} : vector<2x8x128xf32> to vector<2x8x8xf32>
    "tpu.trace_start"() <{level = 10 : i32, message = "bqd,bkd->bqk"}> : () -> ()
    %cst_23 = arith.constant dense<0.000000e+00> : vector<2x8x8xf32>
    %64 = tpu.matmul %61, %62, %cst_23 {dimension_numbers = #tpu.dot_dimension_numbers<[2], [2], [1], [1], [0, 0, 0, 1, 1, 1], [0], [0]>} : vector<2x8x8xf32>, vector<2x8x8xf32>, vector<2x8x8xf32> -> vector<2x8x8xf32>
    "tpu.trace_stop"() : () -> ()
    %65 = arith.addf %64, %20 : vector<2x8x8xf32>
    %cst_24 = arith.constant dense<0xFF800000> : vector<2x8xf32>
    %66 = vector.multi_reduction <maximumf>, %65, %cst_24 [2] : vector<2x8x8xf32> to vector<2x8xf32>
    %67 = vector.shape_cast %66 : vector<2x8xf32> to vector<2x8x1xf32>
    %68 = vector.broadcast %67 : vector<2x8x1xf32> to vector<2x8x8xf32>
    %69 = arith.subf %65, %68 : vector<2x8x8xf32>
    %70 = math.exp %69 : vector<2x8x8xf32>
    %cst_25 = arith.constant dense<0.000000e+00> : vector<2x8xf32>
    %71 = vector.multi_reduction <add>, %70, %cst_25 [2] : vector<2x8x8xf32> to vector<2x8xf32>
    %72 = vector.shape_cast %71 : vector<2x8xf32> to vector<2x8x1xf32>
    %73 = tpu.reciprocal %72 {approx = true} : vector<2x8x1xf32> -> vector<2x8x1xf32>
    %74 = vector.broadcast %73 : vector<2x8x1xf32> to vector<2x8x8xf32>
    %75 = arith.mulf %70, %74 : vector<2x8x8xf32>
    "tpu.trace_start"() <{level = 10 : i32, message = "bqk,bkd->bqd"}> : () -> ()
    %cst_26 = arith.constant dense<0.000000e+00> : vector<2x8x8xf32>
    %76 = tpu.matmul %75, %63, %cst_26 {dimension_numbers = #tpu.dot_dimension_numbers<[2], [1], [1], [2], [0, 0, 0, 1, 1, 2], [0], [0]>} : vector<2x8x8xf32>, vector<2x8x8xf32>, vector<2x8x8xf32> -> vector<2x8x8xf32>
    "tpu.trace_stop"() : () -> ()
    %77 = vector.shape_cast %76 : vector<2x8x8xf32> to vector<16x8xf32>
    %78 = vector.extract_strided_slice %1 {offsets = [8, 0], sizes = [8, 128], strides = [1, 1]} : vector<32x128xf32> to vector<8x128xf32>
    %cst_27 = arith.constant dense<0.000000e+00> : vector<16x128xf32>
    %79 = tpu.matmul %77, %78, %cst_27 {dimension_numbers = #tpu.dot_dimension_numbers<[1], [0], [0], [1], [0, 0, 1, 1], [], []>} : vector<16x8xf32>, vector<8x128xf32>, vector<16x128xf32> -> vector<16x128xf32>
    %80 = arith.addf %60, %79 : vector<16x128xf32>
    %81 = vector.extract_strided_slice %37 {offsets = [0, 0, 16], sizes = [2, 8, 8], strides = [1, 1, 1]} : vector<2x8x128xf32> to vector<2x8x8xf32>
    %82 = vector.extract_strided_slice %38 {offsets = [0, 0, 16], sizes = [2, 8, 8], strides = [1, 1, 1]} : vector<2x8x128xf32> to vector<2x8x8xf32>
    %83 = vector.extract_strided_slice %39 {offsets = [0, 0, 16], sizes = [2, 8, 8], strides = [1, 1, 1]} : vector<2x8x128xf32> to vector<2x8x8xf32>
    "tpu.trace_start"() <{level = 10 : i32, message = "bqd,bkd->bqk"}> : () -> ()
    %cst_28 = arith.constant dense<0.000000e+00> : vector<2x8x8xf32>
    %84 = tpu.matmul %81, %82, %cst_28 {dimension_numbers = #tpu.dot_dimension_numbers<[2], [2], [1], [1], [0, 0, 0, 1, 1, 1], [0], [0]>} : vector<2x8x8xf32>, vector<2x8x8xf32>, vector<2x8x8xf32> -> vector<2x8x8xf32>
    "tpu.trace_stop"() : () -> ()
    %85 = arith.addf %84, %20 : vector<2x8x8xf32>
    %cst_29 = arith.constant dense<0xFF800000> : vector<2x8xf32>
    %86 = vector.multi_reduction <maximumf>, %85, %cst_29 [2] : vector<2x8x8xf32> to vector<2x8xf32>
    %87 = vector.shape_cast %86 : vector<2x8xf32> to vector<2x8x1xf32>
    %88 = vector.broadcast %87 : vector<2x8x1xf32> to vector<2x8x8xf32>
    %89 = arith.subf %85, %88 : vector<2x8x8xf32>
    %90 = math.exp %89 : vector<2x8x8xf32>
    %cst_30 = arith.constant dense<0.000000e+00> : vector<2x8xf32>
    %91 = vector.multi_reduction <add>, %90, %cst_30 [2] : vector<2x8x8xf32> to vector<2x8xf32>
    %92 = vector.shape_cast %91 : vector<2x8xf32> to vector<2x8x1xf32>
    %93 = tpu.reciprocal %92 {approx = true} : vector<2x8x1xf32> -> vector<2x8x1xf32>
    %94 = vector.broadcast %93 : vector<2x8x1xf32> to vector<2x8x8xf32>
    %95 = arith.mulf %90, %94 : vector<2x8x8xf32>
    "tpu.trace_start"() <{level = 10 : i32, message = "bqk,bkd->bqd"}> : () -> ()
    %cst_31 = arith.constant dense<0.000000e+00> : vector<2x8x8xf32>
    %96 = tpu.matmul %95, %83, %cst_31 {dimension_numbers = #tpu.dot_dimension_numbers<[2], [1], [1], [2], [0, 0, 0, 1, 1, 2], [0], [0]>} : vector<2x8x8xf32>, vector<2x8x8xf32>, vector<2x8x8xf32> -> vector<2x8x8xf32>
    "tpu.trace_stop"() : () -> ()
    %97 = vector.shape_cast %96 : vector<2x8x8xf32> to vector<16x8xf32>
    %98 = vector.extract_strided_slice %1 {offsets = [16, 0], sizes = [8, 128], strides = [1, 1]} : vector<32x128xf32> to vector<8x128xf32>
    %cst_32 = arith.constant dense<0.000000e+00> : vector<16x128xf32>
    %99 = tpu.matmul %97, %98, %cst_32 {dimension_numbers = #tpu.dot_dimension_numbers<[1], [0], [0], [1], [0, 0, 1, 1], [], []>} : vector<16x8xf32>, vector<8x128xf32>, vector<16x128xf32> -> vector<16x128xf32>
    %100 = arith.addf %80, %99 : vector<16x128xf32>
    %101 = vector.extract_strided_slice %37 {offsets = [0, 0, 24], sizes = [2, 8, 8], strides = [1, 1, 1]} : vector<2x8x128xf32> to vector<2x8x8xf32>
    %102 = vector.extract_strided_slice %38 {offsets = [0, 0, 24], sizes = [2, 8, 8], strides = [1, 1, 1]} : vector<2x8x128xf32> to vector<2x8x8xf32>
    %103 = vector.extract_strided_slice %39 {offsets = [0, 0, 24], sizes = [2, 8, 8], strides = [1, 1, 1]} : vector<2x8x128xf32> to vector<2x8x8xf32>
    "tpu.trace_start"() <{level = 10 : i32, message = "bqd,bkd->bqk"}> : () -> ()
    %cst_33 = arith.constant dense<0.000000e+00> : vector<2x8x8xf32>
    %104 = tpu.matmul %101, %102, %cst_33 {dimension_numbers = #tpu.dot_dimension_numbers<[2], [2], [1], [1], [0, 0, 0, 1, 1, 1], [0], [0]>} : vector<2x8x8xf32>, vector<2x8x8xf32>, vector<2x8x8xf32> -> vector<2x8x8xf32>
    "tpu.trace_stop"() : () -> ()
    %105 = arith.addf %104, %20 : vector<2x8x8xf32>
    %cst_34 = arith.constant dense<0xFF800000> : vector<2x8xf32>
    %106 = vector.multi_reduction <maximumf>, %105, %cst_34 [2] : vector<2x8x8xf32> to vector<2x8xf32>
    %107 = vector.shape_cast %106 : vector<2x8xf32> to vector<2x8x1xf32>
    %108 = vector.broadcast %107 : vector<2x8x1xf32> to vector<2x8x8xf32>
    %109 = arith.subf %105, %108 : vector<2x8x8xf32>
    %110 = math.exp %109 : vector<2x8x8xf32>
    %cst_35 = arith.constant dense<0.000000e+00> : vector<2x8xf32>
    %111 = vector.multi_reduction <add>, %110, %cst_35 [2] : vector<2x8x8xf32> to vector<2x8xf32>
    %112 = vector.shape_cast %111 : vector<2x8xf32> to vector<2x8x1xf32>
    %113 = tpu.reciprocal %112 {approx = true} : vector<2x8x1xf32> -> vector<2x8x1xf32>
    %114 = vector.broadcast %113 : vector<2x8x1xf32> to vector<2x8x8xf32>
    %115 = arith.mulf %110, %114 : vector<2x8x8xf32>
    "tpu.trace_start"() <{level = 10 : i32, message = "bqk,bkd->bqd"}> : () -> ()
    %cst_36 = arith.constant dense<0.000000e+00> : vector<2x8x8xf32>
    %116 = tpu.matmul %115, %103, %cst_36 {dimension_numbers = #tpu.dot_dimension_numbers<[2], [1], [1], [2], [0, 0, 0, 1, 1, 2], [0], [0]>} : vector<2x8x8xf32>, vector<2x8x8xf32>, vector<2x8x8xf32> -> vector<2x8x8xf32>
    "tpu.trace_stop"() : () -> ()
    %117 = vector.shape_cast %116 : vector<2x8x8xf32> to vector<16x8xf32>
    %118 = vector.extract_strided_slice %1 {offsets = [24, 0], sizes = [8, 128], strides = [1, 1]} : vector<32x128xf32> to vector<8x128xf32>
    %cst_37 = arith.constant dense<0.000000e+00> : vector<16x128xf32>
    %119 = tpu.matmul %117, %118, %cst_37 {dimension_numbers = #tpu.dot_dimension_numbers<[1], [0], [0], [1], [0, 0, 1, 1], [], []>} : vector<16x8xf32>, vector<8x128xf32>, vector<16x128xf32> -> vector<16x128xf32>
    %120 = arith.addf %100, %119 : vector<16x128xf32>
    %121 = vector.extract_strided_slice %0 {offsets = [3, 0], sizes = [1, 128], strides = [1, 1]} : vector<16x128xf32> to vector<1x128xf32>
    %122 = vector.broadcast %121 : vector<1x128xf32> to vector<16x128xf32>
    %123 = arith.addf %120, %122 : vector<16x128xf32>
    %124 = arith.addf %11, %123 : vector<16x128xf32>
    %125 = vector.extract_strided_slice %0 {offsets = [4, 0], sizes = [1, 128], strides = [1, 1]} : vector<16x128xf32> to vector<1x128xf32>
    %126 = vector.extract_strided_slice %0 {offsets = [5, 0], sizes = [1, 128], strides = [1, 1]} : vector<16x128xf32> to vector<1x128xf32>
    %cst_38 = arith.constant dense<0.000000e+00> : vector<16xf32>
    %127 = vector.multi_reduction <add>, %124, %cst_38 [1] : vector<16x128xf32> to vector<16xf32>
    %128 = vector.shape_cast %127 : vector<16xf32> to vector<16x1xf32>
    %cst_39 = arith.constant 3.125000e-02 : f32
    %129 = vector.broadcast %cst_39 : f32 to vector<16x1xf32>
    %130 = arith.mulf %128, %129 : vector<16x1xf32>
    %131 = arith.mulf %124, %124 : vector<16x128xf32>
    %cst_40 = arith.constant dense<0.000000e+00> : vector<16xf32>
    %132 = vector.multi_reduction <add>, %131, %cst_40 [1] : vector<16x128xf32> to vector<16xf32>
    %133 = vector.shape_cast %132 : vector<16xf32> to vector<16x1xf32>
    %cst_41 = arith.constant 3.125000e-02 : f32
    %134 = vector.broadcast %cst_41 : f32 to vector<16x1xf32>
    %135 = arith.mulf %133, %134 : vector<16x1xf32>
    %136 = arith.mulf %130, %130 : vector<16x1xf32>
    %137 = arith.subf %135, %136 : vector<16x1xf32>
    %138 = vector.broadcast %130 : vector<16x1xf32> to vector<16x128xf32>
    %139 = arith.subf %124, %138 : vector<16x128xf32>
    %cst_42 = arith.constant 9.99999974E-6 : f32
    %140 = vector.broadcast %cst_42 : f32 to vector<16x1xf32>
    %141 = arith.addf %137, %140 : vector<16x1xf32>
    %142 = math.rsqrt %141 : vector<16x1xf32>
    %143 = vector.broadcast %142 : vector<16x1xf32> to vector<16x128xf32>
    %144 = arith.mulf %139, %143 : vector<16x128xf32>
    %145 = vector.broadcast %125 : vector<1x128xf32> to vector<16x128xf32>
    %146 = arith.mulf %144, %145 : vector<16x128xf32>
    %147 = vector.broadcast %126 : vector<1x128xf32> to vector<16x128xf32>
    %148 = arith.addf %146, %147 : vector<16x128xf32>
    %c0_43 = arith.constant 0 : index
    %c0_44 = arith.constant 0 : index
    %149 = vector.load %arg6[%c0_43, %c0_44] : memref<128x128xf32, #tpu.memory_space<vmem>>, vector<128x128xf32>
    %cst_45 = arith.constant dense<0.000000e+00> : vector<16x128xf32>
    %150 = tpu.matmul %148, %149, %cst_45 {dimension_numbers = #tpu.dot_dimension_numbers<[1], [0], [0], [1], [0, 0, 1, 1], [], []>} : vector<16x128xf32>, vector<128x128xf32>, vector<16x128xf32> -> vector<16x128xf32>
    %151 = vector.extract_strided_slice %0 {offsets = [6, 0], sizes = [1, 128], strides = [1, 1]} : vector<16x128xf32> to vector<1x128xf32>
    %152 = vector.broadcast %151 : vector<1x128xf32> to vector<16x128xf32>
    %153 = arith.addf %150, %152 : vector<16x128xf32>
    %154 = arith.mulf %153, %153 : vector<16x128xf32>
    %155 = arith.mulf %153, %154 : vector<16x128xf32>
    %cst_46 = arith.constant 4.471500e-02 : f32
    %156 = vector.broadcast %cst_46 : f32 to vector<16x128xf32>
    %157 = arith.mulf %156, %155 : vector<16x128xf32>
    %158 = arith.addf %153, %157 : vector<16x128xf32>
    %cst_47 = arith.constant 0.797884583 : f32
    %159 = vector.broadcast %cst_47 : f32 to vector<16x128xf32>
    %160 = arith.mulf %159, %158 : vector<16x128xf32>
    %161 = math.tanh %160 : vector<16x128xf32>
    %cst_48 = arith.constant 1.000000e+00 : f32
    %162 = vector.broadcast %cst_48 : f32 to vector<16x128xf32>
    %163 = arith.addf %162, %161 : vector<16x128xf32>
    %cst_49 = arith.constant 5.000000e-01 : f32
    %164 = vector.broadcast %cst_49 : f32 to vector<16x128xf32>
    %165 = arith.mulf %164, %163 : vector<16x128xf32>
    %166 = arith.mulf %153, %165 : vector<16x128xf32>
    %c0_50 = arith.constant 0 : index
    %c0_51 = arith.constant 0 : index
    %167 = vector.load %arg7[%c0_50, %c0_51] : memref<128x128xf32, #tpu.memory_space<vmem>>, vector<128x128xf32>
    %cst_52 = arith.constant dense<0.000000e+00> : vector<16x128xf32>
    %168 = tpu.matmul %166, %167, %cst_52 {dimension_numbers = #tpu.dot_dimension_numbers<[1], [0], [0], [1], [0, 0, 1, 1], [], []>} : vector<16x128xf32>, vector<128x128xf32>, vector<16x128xf32> -> vector<16x128xf32>
    %169 = vector.extract_strided_slice %0 {offsets = [7, 0], sizes = [1, 128], strides = [1, 1]} : vector<16x128xf32> to vector<1x128xf32>
    %170 = vector.broadcast %169 : vector<1x128xf32> to vector<16x128xf32>
    %171 = arith.addf %168, %170 : vector<16x128xf32>
    %172 = arith.addf %148, %171 : vector<16x128xf32>
    %173 = vector.extract_strided_slice %0 {offsets = [8, 0], sizes = [1, 128], strides = [1, 1]} : vector<16x128xf32> to vector<1x128xf32>
    %174 = vector.extract_strided_slice %0 {offsets = [9, 0], sizes = [1, 128], strides = [1, 1]} : vector<16x128xf32> to vector<1x128xf32>
    %cst_53 = arith.constant dense<0.000000e+00> : vector<16xf32>
    %175 = vector.multi_reduction <add>, %172, %cst_53 [1] : vector<16x128xf32> to vector<16xf32>
    %176 = vector.shape_cast %175 : vector<16xf32> to vector<16x1xf32>
    %cst_54 = arith.constant 3.125000e-02 : f32
    %177 = vector.broadcast %cst_54 : f32 to vector<16x1xf32>
    %178 = arith.mulf %176, %177 : vector<16x1xf32>
    %179 = arith.mulf %172, %172 : vector<16x128xf32>
    %cst_55 = arith.constant dense<0.000000e+00> : vector<16xf32>
    %180 = vector.multi_reduction <add>, %179, %cst_55 [1] : vector<16x128xf32> to vector<16xf32>
    %181 = vector.shape_cast %180 : vector<16xf32> to vector<16x1xf32>
    %cst_56 = arith.constant 3.125000e-02 : f32
    %182 = vector.broadcast %cst_56 : f32 to vector<16x1xf32>
    %183 = arith.mulf %181, %182 : vector<16x1xf32>
    %184 = arith.mulf %178, %178 : vector<16x1xf32>
    %185 = arith.subf %183, %184 : vector<16x1xf32>
    %186 = vector.broadcast %178 : vector<16x1xf32> to vector<16x128xf32>
    %187 = arith.subf %172, %186 : vector<16x128xf32>
    %cst_57 = arith.constant 9.99999974E-6 : f32
    %188 = vector.broadcast %cst_57 : f32 to vector<16x1xf32>
    %189 = arith.addf %185, %188 : vector<16x1xf32>
    %190 = math.rsqrt %189 : vector<16x1xf32>
    %191 = vector.broadcast %190 : vector<16x1xf32> to vector<16x128xf32>
    %192 = arith.mulf %187, %191 : vector<16x128xf32>
    %193 = vector.broadcast %173 : vector<1x128xf32> to vector<16x128xf32>
    %194 = arith.mulf %192, %193 : vector<16x128xf32>
    %195 = vector.broadcast %174 : vector<1x128xf32> to vector<16x128xf32>
    %196 = arith.addf %194, %195 : vector<16x128xf32>
    %c0_58 = arith.constant 0 : index
    %c0_59 = arith.constant 0 : index
    %197 = vector.load %arg8[%c0_58, %c0_59] : memref<128x128xf32, #tpu.memory_space<vmem>>, vector<128x128xf32>
    %cst_60 = arith.constant dense<0.000000e+00> : vector<16x128xf32>
    %198 = tpu.matmul %196, %197, %cst_60 {dimension_numbers = #tpu.dot_dimension_numbers<[1], [0], [0], [1], [0, 0, 1, 1], [], []>} : vector<16x128xf32>, vector<128x128xf32>, vector<16x128xf32> -> vector<16x128xf32>
    %199 = vector.extract_strided_slice %0 {offsets = [10, 0], sizes = [1, 128], strides = [1, 1]} : vector<16x128xf32> to vector<1x128xf32>
    %200 = vector.broadcast %199 : vector<1x128xf32> to vector<16x128xf32>
    %201 = arith.addf %198, %200 : vector<16x128xf32>
    %202 = vector.shape_cast %201 : vector<16x128xf32> to vector<2x8x128xf32>
    %c0_61 = arith.constant 0 : index
    %c0_62 = arith.constant 0 : index
    %c0_63 = arith.constant 0 : index
    %203 = vector.load %arg10[%c0_61, %c0_62, %c0_63] : memref<2x8x128xf32, #tpu.memory_space<vmem>>, vector<2x8x128xf32>
    tpu.vector_store %arg10[%c0_61, %c0_62, %c0_63], %202 {strides = array<i32>} : memref<2x8x128xf32, #tpu.memory_space<vmem>>, vector<2x8x128xf32>,
    return
  }
}

</mosaic_0001>

<bundles_post_ra>
// kernel: custom_transformer_forward.1
= control target key start
LH: loop header
LB: loop body
LE: loop exit
PB: predicated region body
PF: predicated region fallthrough
CT: control target
= control target key end

     0   :  { %15 = vsyncpa [#allocation3], 0  ;;  %s3926_s0 = inlined_call_operand.vmem [shape: s32[2,8], index: 0, kind: input, shape index: {}]   ;;  %s3927_s1 = inlined_call_operand.vmem [shape: s32[16,1], index: 1, kind: input, shape index: {}]   ;;  %s3928_s2 = inlined_call_operand.hbm [shape: f32[128,128], index: 2, kind: input, shape index: {}]   ;;  %s3929_s3 = inlined_call_operand.hbm [shape: f32[16,128], index: 3, kind: input, shape index: {}]   ;;  %s3930_s4 = inlined_call_operand.hbm [shape: f32[128,384], index: 4, kind: input, shape index: {}]   ;;  %s3931_s5 = inlined_call_operand.vmem [shape: f32[32,128], index: 5, kind: input, shape index: {}]   ;;  %s3932_s6 = inlined_call_operand.hbm [shape: f32[128,128], index: 6, kind: input, shape index: {}]   ;;  %s3933_s7 = inlined_call_operand.hbm [shape: f32[128,128], index: 7, kind: input, shape index: {}]   ;;  %s3934_s8 = inlined_call_operand.hbm [shape: f32[128,128], index: 8, kind: input, shape index: {}]   ;;  %s3935_s9 = inlined_call_operand.hbm [shape: f32[16,128], index: 9, kind: input, shape index: {}]   ;;  %s3936_s10 = inlined_call_operand.hbm [shape: f32[2,8,128], index: 10, kind: output, shape index: {}]  }
   0x1   :  { %16 = vsyncpa [#allocation6], 0 }
   0x2   :  { %17 = vsyncpa [#allocation9], 0 }
   0x3   :  { %18 = vsyncpa [#allocation12], 0 }
   0x4   :  { %19 = vsyncpa [#allocation4], 0  ;;  %s3449_s13 = smov [#allocation5]   ;;  %s3450_s15 = smov [#allocation8]  }
   0x5   :  { %s41_s14 = sshll.u32 %s3449_s13, 4  ;;  %s67_s16 = sshll.u32 %s3450_s15, 4  ;;  %s42_s14 = int_to_ptr.vmem [resolvable:$true] %s41_s14  ;;  %s3525_s16 = int_to_ptr.vmem [resolvable:$true] %s67_s16 }
   0x6   :  { %s3263_s19 = scalar_lea.hbm %s3929_s3, 256 }
   0x7   :  { %p3264_p0 = scmp.ne.s32.totalorder %s3929_s3, %s3263_s19  ;;  %p3267_p1 = scmp.lt.u32.totalorder %s3263_s19, %s3929_s3 }
   0x9   :  { %p3269_p2 = pnand %p3267_p1, %p3264_p0 }
   0xb   :  { %3272 = shalt.err (!%p3269_p2)
}
   0xc   :  { %s3273_s24 = scalar_lea.vmem %s42_s14, 256  ;;  %p3278_p4 = scmp.lt.s32.totalorder %s42_s14, %s42_s14 }
   0xd   :  { %p3274_p3 = scmp.ne.s32.totalorder %s42_s14, %s3273_s24  ;;  %p3279_p5 = scmp.lt.s32.totalorder %s3273_s24, %s3273_s24 }
   0xf   :  { %p3280_p6 = por %p3279_p5, %p3278_p4 }
  0x11   :  { %p3281_p7 = pnand %p3280_p6, %p3274_p3 }
  0x13   :  { %3284 = shalt.err (!%p3281_p7)
}
  0x14   :  { %s3451_s25 = smov 128   ;;  %s3452_s26 = smov 8  }
  0x15   :  { %47 = dma.hbm_to_vmem [thread:$0]  %s3929_s3, 256, %s42_s14, [#allocation6], %s3451_s25, %s3451_s25, %s3452_s26  }
  0x16   :  { %s3285_s11 = scalar_lea.hbm %s3932_s6, 2048 }
  0x17   :  { %p3286_p8 = scmp.ne.s32.totalorder %s3932_s6, %s3285_s11  ;;  %p3289_p9 = scmp.lt.u32.totalorder %s3285_s11, %s3932_s6 }
  0x19   :  { %p3291_p10 = pnand %p3289_p9, %p3286_p8 }
  0x1b   :  { %3294 = shalt.err (!%p3291_p10)
}
  0x1c   :  { %s3295_s18 = scalar_lea.vmem %s3525_s16, 2048  ;;  %p3300_p12 = scmp.lt.s32.totalorder %s3525_s16, %s3525_s16 }
  0x1d   :  { %p3296_p11 = scmp.ne.s32.totalorder %s3525_s16, %s3295_s18  ;;  %p3301_p13 = scmp.lt.s32.totalorder %s3295_s18, %s3295_s18 }
  0x1f   :  { %p3302_p0 = por %p3301_p13, %p3300_p12 }
  0x21   :  { %p3303_p1 = pnand %p3302_p0, %p3296_p11 }
  0x23   :  { %3306 = shalt.err (!%p3303_p1)
}
  0x24   :  { %73 = dma.hbm_to_vmem [thread:$0]  %s3932_s6, 2048, %s3525_s16, [#allocation9], %s3451_s25, %s3451_s25, %s3452_s26  }
  0x25   :  { %s3453_s19 = smov [#allocation11]   ;;  %s3454_s21 = smov [#allocation2]  }
  0x26   :  { %s91_s20 = sshll.u32 %s3453_s19, 4  ;;  %s29_s22 = sshll.u32 %s3454_s21, 4  ;;  %s92_s20 = int_to_ptr.vmem [resolvable:$true] %s91_s20  ;;  %s3562_s22 = int_to_ptr.vmem [resolvable:$true] %s29_s22 }
  0x27   :  { %s3307_s27 = scalar_lea.hbm %s3934_s8, 2048 }
  0x28   :  { %p3308_p2 = scmp.ne.s32.totalorder %s3934_s8, %s3307_s27  ;;  %p3311_p3 = scmp.lt.u32.totalorder %s3307_s27, %s3934_s8 }
  0x2a   :  { %p3313_p4 = pnand %p3311_p3, %p3308_p2 }
  0x2c   :  { %3316 = shalt.err (!%p3313_p4)
}
  0x2d   :  { %s3317_s6 = scalar_lea.vmem %s92_s20, 2048  ;;  %p3322_p6 = scmp.lt.s32.totalorder %s92_s20, %s92_s20 }
  0x2e   :  { %p3318_p5 = scmp.ne.s32.totalorder %s92_s20, %s3317_s6  ;;  %p3323_p7 = scmp.lt.s32.totalorder %s3317_s6, %s3317_s6 }
  0x30   :  { %p3324_p8 = por %p3323_p7, %p3322_p6 }
  0x32   :  { %p3325_p9 = pnand %p3324_p8, %p3318_p5 }
  0x34   :  { %3328 = shalt.err (!%p3325_p9)
}
  0x35   :  { %97 = dma.hbm_to_vmem [thread:$0]  %s3934_s8, 2048, %s92_s20, [#allocation12], %s3451_s25, %s3451_s25, %s3452_s26  }
  0x36   :  { %s3329_s17 = scalar_lea.hbm %s3928_s2, 2048 }
  0x37   :  { %p3330_p10 = scmp.ne.s32.totalorder %s3928_s2, %s3329_s17  ;;  %p3333_p11 = scmp.lt.u32.totalorder %s3329_s17, %s3928_s2 }
  0x39   :  { %p3335_p12 = pnand %p3333_p11, %p3330_p10 }
  0x3b   :  { %3338 = shalt.err (!%p3335_p12)
}
  0x3c   :  { %s3339_s21 = scalar_lea.vmem %s3562_s22, 2048  ;;  %p3344_p0 = scmp.lt.s32.totalorder %s3562_s22, %s3562_s22 }
  0x3d   :  { %p3340_p13 = scmp.ne.s32.totalorder %s3562_s22, %s3339_s21  ;;  %p3345_p1 = scmp.lt.s32.totalorder %s3339_s21, %s3339_s21 }
  0x3f   :  { %p3346_p2 = por %p3345_p1, %p3344_p0 }
  0x41   :  { %p3347_p3 = pnand %p3346_p2, %p3340_p13 }
  0x43   :  { %3350 = shalt.err (!%p3347_p3)
}
  0x44   :  { %35 = dma.hbm_to_vmem [thread:$0]  %s3928_s2, 2048, %s3562_s22, [#allocation3], %s3451_s25, %s3451_s25, %s3452_s26  }
  0x45   :  { %s3455_s23 = smov [#allocation7]   ;;  %s3351_s29 = scalar_lea.hbm %s3930_s4, 6144 }
  0x46   :  { %s53_s24 = sshll.u32 %s3455_s23, 4  ;;  %p3352_p4 = scmp.ne.s32.totalorder %s3930_s4, %s3351_s29  ;;  %s54_s24 = int_to_ptr.vmem [resolvable:$true] %s53_s24 }
  0x47   :  { %p3355_p5 = scmp.lt.u32.totalorder %s3351_s29, %s3930_s4 }
  0x49   :  { %p3357_p6 = pnand %p3355_p5, %p3352_p4 }
  0x4b   :  { %3360 = shalt.err (!%p3357_p6)
}
  0x4c   :  { %s3361_s12 = scalar_lea.vmem %s54_s24, 6144  ;;  %p3366_p8 = scmp.lt.s32.totalorder %s54_s24, %s54_s24 }
  0x4d   :  { %p3362_p7 = scmp.ne.s32.totalorder %s54_s24, %s3361_s12  ;;  %p3367_p9 = scmp.lt.s32.totalorder %s3361_s12, %s3361_s12 }
  0x4f   :  { %p3368_p10 = por %p3367_p9, %p3366_p8 }
  0x51   :  { %p3369_p11 = pnand %p3368_p10, %p3362_p7 }
  0x53   :  { %3372 = shalt.err (!%p3369_p11)
}
  0x54   :  { %s3456_s2 = smov 384   ;;  %s3457_s22 = smov 24  }
  0x55   :  { %59 = dma.hbm_to_vmem [thread:$0]  %s3930_s4, 6144, %s54_s24, [#allocation6], %s3456_s2, %s3456_s2, %s3457_s22  }
  0x56   :  { %s3458_s17 = smov [#allocation10]   ;;  %s3459_s3 = smov [#allocation13]  }
  0x57   :  { %s79_s18 = sshll.u32 %s3458_s17, 4  ;;  %s103_s14 = sshll.u32 %s3459_s3, 4  ;;  %s80_s18 = int_to_ptr.vmem [resolvable:$true] %s79_s18  ;;  %s104_s14 = int_to_ptr.vmem [resolvable:$true] %s103_s14 }
  0x58   :  { %s3373_s8 = scalar_lea.hbm %s3933_s7, 2048 }
  0x59   :  { %p3374_p12 = scmp.ne.s32.totalorder %s3933_s7, %s3373_s8  ;;  %p3377_p13 = scmp.lt.u32.totalorder %s3373_s8, %s3933_s7 }
  0x5b   :  { %p3379_p0 = pnand %p3377_p13, %p3374_p12 }
  0x5d   :  { %3382 = shalt.err (!%p3379_p0)
}
  0x5e   :  { %s3383_s4 = scalar_lea.vmem %s80_s18, 2048  ;;  %p3388_p2 = scmp.lt.s32.totalorder %s80_s18, %s80_s18 }
  0x5f   :  { %p3384_p1 = scmp.ne.s32.totalorder %s80_s18, %s3383_s4  ;;  %p3389_p3 = scmp.lt.s32.totalorder %s3383_s4, %s3383_s4 }
  0x61   :  { %p3390_p4 = por %p3389_p3, %p3388_p2 }
  0x63   :  { %p3391_p5 = pnand %p3390_p4, %p3384_p1 }
  0x65   :  { %3394 = shalt.err (!%p3391_p5)
}
  0x66   :  { %85 = dma.hbm_to_vmem [thread:$0]  %s3933_s7, 2048, %s80_s18, [#allocation9], %s3451_s25, %s3451_s25, %s3452_s26  }
  0x67   :  { %s3395_s6 = scalar_lea.hbm %s3935_s9, 256 }
  0x68   :  { %p3396_p6 = scmp.ne.s32.totalorder %s3935_s9, %s3395_s6  ;;  %p3399_p7 = scmp.lt.u32.totalorder %s3395_s6, %s3935_s9 }
  0x6a   :  { %p3401_p8 = pnand %p3399_p7, %p3396_p6 }
  0x6c   :  { %3404 = shalt.err (!%p3401_p8)
}
  0x6d   :  { %s3405_s13 = scalar_lea.vmem %s104_s14, 256  ;;  %p3410_p10 = scmp.lt.s32.totalorder %s104_s14, %s104_s14 }
  0x6e   :  { %p3406_p9 = scmp.ne.s32.totalorder %s104_s14, %s3405_s13  ;;  %p3411_p11 = scmp.lt.s32.totalorder %s3405_s13, %s3405_s13 }
  0x70   :  { %p3412_p12 = por %p3411_p11, %p3410_p10 }
  0x72   :  { %p3413_p13 = pnand %p3412_p12, %p3406_p9 }
  0x74   :  { %3416 = shalt.err (!%p3413_p13)
}
  0x75   :  { %109 = dma.hbm_to_vmem [thread:$0]  %s3935_s9, 256, %s104_s14, [#allocation12], %s3451_s25, %s3451_s25, %s3452_s26  }
  0x76   :  { %3439 = dma.done.wait [#allocation3], 2048  }
  0x77   :  { %3440 = vsyncadd [#allocation3], 4294965248 }
  0x78   :  { %3441 = dma.done.wait [#allocation6], 6400  }
  0x79   :  { %3442 = vsyncadd [#allocation6], 4294960896 }
  0x7a   :  { %3443 = dma.done.wait [#allocation9], 4096  }
  0x7b   :  { %3444 = vsyncadd [#allocation9], 4294963200 }
  0x7c   :  { %3445 = dma.done.wait [#allocation12], 2304  }
  0x7d   :  { %3446 = vsyncadd [#allocation12], 4294964992  ;;  %v3460_v0 = vmov 0   ;;  %v139_v1 = vld [vmem:[%s3927_s1] sm:$0xff]  ;;  %v154_v3 = vld [vmem:[#allocation2 + $0x8] sm:$0xff]  ;;  %vm3463_vm2 = vmmov 0  }
  0x7e   :  { %3218 = vset.pattern.permute.xlu0 %v3460_v0  ;;  %v153_v2 = vld [vmem:[#allocation2] sm:$0xff]  ;;  %v155_v4 = vld [vmem:[#allocation2 + $0x10] sm:$0xff]  ;;  %v156_v5 = vld [vmem:[#allocation2 + $0x18] sm:$0xff]  ;;  %vm502_vm3 = vcmask 64512   ;;  %s3467_s19 = smov 112   ;;  %s3468_s27 = smov 104  }
  0x7f   :  { %142 = vperm.xlu0 %3218, %v139_v1   ;;  %v140_v6 = vld [vmem:[%s3927_s1 + $0x8] sm:$0xff]  ;;  %v2999_v7 = vpack.c.bf16 %v154_v3, %v153_v2  ;;  %v3003_v8 = vpack.c.bf16 %v156_v5, %v155_v4  ;;  %v157_v9 = vld [vmem:[#allocation2 + $0x20] sm:$0xff]  ;;  %v283_v12 = vld [vmem:[#allocation7 + $0x8] sm:$0xff] }
  0x80   :  { %v158_v10 = vld [vmem:[#allocation2 + $0x28] sm:$0xff]  ;;  %v286_v13 = vld [vmem:[#allocation7 + $0x20] sm:$0xff]  ;;  %v160_v16 = vld [vmem:[#allocation2 + $0x38] sm:$0xff] }
  0x81   :  { %3000 = vmatprep.subr.bf16.mxu0 %v2999_v7  ;;  %v3007_v11 = vpack.c.bf16 %v158_v10, %v157_v9  ;;  %v282_v14 = vld [vmem:[#allocation7] sm:$0xff]  ;;  %v3031_v17 = vpack.c.bf16 %v286_v13, %v283_v12  ;;  %v285_v18 = vld [vmem:[#allocation7 + $0x18] sm:$0xff]  ;;  %v292_v21 = vld [vmem:[#allocation7 + $0x50] sm:$0xff]  ;;  %v3461_v13 = vmov 1.0  }
  0x82   :  { %3002 = vmatpush3.bf16.msra.mxu0 %v2999_v7  ;;  %v159_v15 = vld [vmem:[#allocation2 + $0x30] sm:$0xff]  ;;  %v3033_v19 = vpack.c.bf16 %v285_v18, %v282_v14  ;;  %v289_v20 = vld [vmem:[#allocation7 + $0x38] sm:$0xff]  ;;  %v288_v22 = vld [vmem:[#allocation7 + $0x30] sm:$0xff] }
  0x83   :  { %145 = vperm.xlu0 %3218, %v140_v6   ;;  %3004 = vmatprep.subr.bf16.mxu0 %v3003_v8  ;;  %v3035_v23 = vpack.c.bf16 %v292_v21, %v289_v20  ;;  %v291_v24 = vld [vmem:[#allocation7 + $0x48] sm:$0xff]  ;;  %v3011_v25 = vpack.c.bf16 %v160_v16, %v159_v15  ;;  %v161_v26 = vld [vmem:[#allocation2 + $0x40] sm:$0xff]  ;;  %v162_v27 = vld [vmem:[#allocation2 + $0x48] sm:$0xff] }
  0x84   :  { %3032 = vmatprep.subr.bf16.mxu1 %v3031_v17  ;;  %v3037_v28 = vpack.c.bf16 %v291_v24, %v288_v22  ;;  %v295_v29 = vld [vmem:[#allocation7 + $0x68] sm:$0xff]  ;;  %v298_v30 = vld [vmem:[#allocation7 + $0x80] sm:$0xff]  ;;  %v297_v33 = vld [vmem:[#allocation7 + $0x78] sm:$0xff]  ;;  %v3015_v34 = vpack.c.bf16 %v162_v27, %v161_v26 }
  0x85   :  { %3034 = vmatpush1.bf16.msra.mxu1 %v3033_v19  ;;  %v294_v31 = vld [vmem:[#allocation7 + $0x60] sm:$0xff]  ;;  %v3039_v32 = vpack.c.bf16 %v298_v30, %v295_v29  ;;  %v164_v36 = vld [vmem:[#allocation2 + $0x58] sm:$0xff]  ;;  %v301_v38 = vld [vmem:[#allocation7 + $0x98] sm:$0xff] }
  0x86   :  { %3006 = vmatpush3.bf16.msra.mxu0 %v3003_v8  ;;  %3036 = vmatprep.subr.bf16.mxu1 %v3035_v23  ;;  %v163_v35 = vld [vmem:[#allocation2 + $0x50] sm:$0xff]  ;;  %v3041_v37 = vpack.c.bf16 %v297_v33, %v294_v31  ;;  %v304_v39 = vld [vmem:[#allocation7 + $0xb0] sm:$0xff]  ;;  %v303_v42 = vld [vmem:[#allocation7 + $0xa8] sm:$0xff]  ;;  %v137_v8 = vlaneseq }
  0x87   :  { %3008 = vmatprep.subr.bf16.mxu0 %v3007_v11  ;;  %v300_v40 = vld [vmem:[#allocation7 + $0x90] sm:$0xff]  ;;  %v3043_v41 = vpack.c.bf16 %v304_v39, %v301_v38  ;;  %v3019_v43 = vpack.c.bf16 %v164_v36, %v163_v35  ;;  %v166_v45 = vld [vmem:[#allocation2 + $0x68] sm:$0xff]  ;;  %v307_v47 = vld [vmem:[#allocation7 + $0xc8] sm:$0xff] }
  0x88   :  { %v165_v44 = vld [vmem:[#allocation2 + $0x60] sm:$0xff]  ;;  %v3045_v46 = vpack.c.bf16 %v303_v42, %v300_v40  ;;  %v310_v48 = vld [vmem:[#allocation7 + $0xe0] sm:$0xff]  ;;  %v309_v51 = vld [vmem:[#allocation7 + $0xd8] sm:$0xff]  ;;  %v138_v9 = vand.u32 127, %v137_v8  ;;  %v3462_v40 = vmov 0.0  }
  0x89   :  { %3038 = vmatpush1.bf16.msra.mxu1 %v3037_v28  ;;  %v306_v49 = vld [vmem:[#allocation7 + $0xc0] sm:$0xff]  ;;  %v3047_v50 = vpack.c.bf16 %v310_v48, %v307_v47  ;;  %v3023_v52 = vpack.c.bf16 %v166_v45, %v165_v44  ;;  %v168_v54 = vld [vmem:[#allocation2 + $0x78] sm:$0xff]  ;;  %v313_v56 = vld [vmem:[#allocation7 + $0xf8] sm:$0xff]  ;;  %394 = vmatprep.mubr.f32.mxu1 %v3462_v40  ;;  %v3665_v47 = vshrl.u32 %v137_v8, 7 }
  0x8a   :  { %3010 = vmatpush3.bf16.msra.mxu0 %v3007_v11  ;;  %3040 = vmatprep.subr.bf16.mxu1 %v3039_v32  ;;  %v167_v53 = vld [vmem:[#allocation2 + $0x70] sm:$0xff]  ;;  %v3049_v55 = vpack.c.bf16 %v309_v51, %v306_v49  ;;  %v316_v57 = vld [vmem:[#allocation7 + $0x110] sm:$0xff]  ;;  %v315_v60 = vld [vmem:[#allocation7 + $0x108] sm:$0xff] }
  0x8b   :  { %3012 = vmatprep.subr.bf16.mxu0 %v3011_v25  ;;  %v312_v58 = vld [vmem:[#allocation7 + $0xf0] sm:$0xff]  ;;  %v3051_v59 = vpack.c.bf16 %v316_v57, %v313_v56  ;;  %v3027_v61 = vpack.c.bf16 %v168_v54, %v167_v53  ;;  %v287_v63 = vld [vmem:[#allocation7 + $0x28] sm:$0xff]  ;;  %v322_v2 = vld [vmem:[#allocation7 + $0x140] sm:$0xff]  ;;  %v3668_v48 = vsub.s32 0, %v3665_v47  ;;  %v498_v51 = vsub.s32 2, %v3665_v47 }
  0x8c   :  { %v284_v62 = vld [vmem:[#allocation7 + $0x10] sm:$0xff]  ;;  %v3053_v0 = vpack.c.bf16 %v315_v60, %v312_v58  ;;  %v319_v1 = vld [vmem:[#allocation7 + $0x128] sm:$0xff]  ;;  %v318_v3 = vld [vmem:[#allocation7 + $0x120] sm:$0xff] }
  0x8d   :  { %3042 = vmatpush1.bf16.msra.mxu1 %v3041_v37  ;;  %v3055_v4 = vpack.c.bf16 %v322_v2, %v319_v1  ;;  %v321_v5 = vld [vmem:[#allocation7 + $0x138] sm:$0xff]  ;;  %v3063_v6 = vpack.c.bf16 %v287_v63, %v284_v62  ;;  %v290_v11 = vld [vmem:[#allocation7 + $0x40] sm:$0xff]  ;;  %v296_v16 = vld [vmem:[#allocation7 + $0x70] sm:$0xff] }
  0x8e   :  { %3014 = vmatpush3.bf16.msra.mxu0 %v3011_v25  ;;  %3044 = vmatprep.subr.bf16.mxu1 %v3043_v41  ;;  %v3057_v7 = vpack.c.bf16 %v321_v5, %v318_v3  ;;  %v293_v12 = vld [vmem:[#allocation7 + $0x58] sm:$0xff]  ;;  %v299_v17 = vld [vmem:[#allocation7 + $0x88] sm:$0xff]  ;;  %v302_v19 = vld [vmem:[#allocation7 + $0xa0] sm:$0xff]  ;;  %v3464_v5 = vmov 1966171168  }
  0x8f   :  { %3016 = vmatprep.subr.bf16.mxu0 %v3015_v34  ;;  %v3067_v15 = vpack.c.bf16 %v293_v12, %v290_v11  ;;  %v3071_v18 = vpack.c.bf16 %v299_v17, %v296_v16  ;;  %v305_v20 = vld [vmem:[#allocation7 + $0xb8] sm:$0xff]  ;;  %v308_v22 = vld [vmem:[#allocation7 + $0xd0] sm:$0xff]  ;;  %v311_v23 = vld [vmem:[#allocation7 + $0xe8] sm:$0xff] }
  0x90   :  { %v3075_v21 = vpack.c.bf16 %v305_v20, %v302_v19  ;;  %v3079_v24 = vpack.c.bf16 %v311_v23, %v308_v22  ;;  %v314_v25 = vld [vmem:[#allocation7 + $0x100] sm:$0xff]  ;;  %v317_v26 = vld [vmem:[#allocation7 + $0x118] sm:$0xff]  ;;  %v320_v28 = vld [vmem:[#allocation7 + $0x130] sm:$0xff] }
  0x91   :  { %3046 = vmatpush1.bf16.msra.mxu1 %v3045_v46  ;;  %v3083_v27 = vpack.c.bf16 %v317_v26, %v314_v25  ;;  %v323_v29 = vld [vmem:[#allocation7 + $0x148] sm:$0xff]  ;;  %v325_v31 = vld [vmem:[#allocation7 + $0x158] sm:$0xff]  ;;  %v328_v32 = vld [vmem:[#allocation7 + $0x170] sm:$0xff] }
  0x92   :  { %3018 = vmatpush3.bf16.msra.mxu0 %v3015_v34  ;;  %3048 = vmatprep.subr.bf16.mxu1 %v3047_v50  ;;  %v3087_v30 = vpack.c.bf16 %v323_v29, %v320_v28  ;;  %v3059_v33 = vpack.c.bf16 %v328_v32, %v325_v31  ;;  %v324_v34 = vld [vmem:[#allocation7 + $0x150] sm:$0xff]  ;;  %v327_v35 = vld [vmem:[#allocation7 + $0x168] sm:$0xff]  ;;  %v326_v36 = vld [vmem:[#allocation7 + $0x160] sm:$0xff]  ;;  %v492_v50 = vsub.s32 1, %v3665_v47 }
  0x93   :  { %3020 = vmatprep.subr.bf16.mxu0 %v3019_v43  ;;  %v3061_v37 = vpack.c.bf16 %v327_v35, %v324_v34  ;;  %v329_v38 = vld [vmem:[#allocation7 + $0x178] sm:$0xff]  ;;  %v169_v41 = vld [vmem:[#allocation5] sm:$0xff]  ;;  %v3670_v49 = vld [vmem:[#allocation13] sm:$0xff] }
  0x94   :  { %v3091_v39 = vpack.c.bf16 %v329_v38, %v326_v36  ;;  %v170_v42 = vld [vmem:[#allocation5 + $0x8] sm:$0xff]  ;;  %v493_v53 = vrot.slane %v3670_v49, %v492_v50  ;;  %v499_v54 = vrot.slane %v3670_v49, %v498_v51 }
  0x95   :  { %3050 = vmatpush1.bf16.msra.mxu1 %v3049_v55 }
  0x96   :  { %3022 = vmatpush3.bf16.msra.mxu0 %v3019_v43  ;;  %3052 = vmatprep.subr.bf16.mxu1 %v3051_v59 }
  0x97   :  { %3024 = vmatprep.subr.bf16.mxu0 %v3023_v52 }
  0x99   :  { %3054 = vmatpush1.bf16.msra.mxu1 %v3053_v0 }
  0x9a   :  { %3026 = vmatpush3.bf16.msra.mxu0 %v3023_v52  ;;  %3056 = vmatprep.subr.bf16.mxu1 %v3055_v4  ;;  %v485_v52 = vrot.slane %v3670_v49, %v3668_v48 }
  0x9b   :  { %3028 = vmatprep.subr.bf16.mxu0 %v3027_v61 }
  0x9d   :  { %3058 = vmatpush1.bf16.msra.mxu1 %v3057_v7  ;;  %v246_v7 = vld [vmem:[%s3926_s0] sm:$0x3]  ;;  %s3466_s0 = smov 120  }
  0x9e   :  { %3030 = vmatpush3.bf16.msra.mxu0 %v3027_v61  ;;  %3060 = vmatprep.subr.bf16.mxu1 %v3059_v33  ;;  %vm247_vm4 = vcmp.ne.s32.totalorder %v246_v7, 0 }
  0x9f   :  { %3064 = vmatprep.subr.bf16.mxu0 %v3063_v6 }
  0xa1   :  { %3062 = vmatpush1.bf16.msra.mxu1 %v3061_v37 }
  0xa2   :  { %2794 = vmatprep.subr.mxu1 %v3462_v40 }
  0xfe   :  { %v143_v10 = vpop.permute.xlu0 %142 }
  0xff   :  { %vm147_vm0 = vcmp.eq.s32.totalorder %v138_v9, %v143_v10  ;;  %v3465_v10 = vmov -1e+09  }
 0x100   :  { %2756 = vmatprep.mubr.msk.f32.mxu0 %vm147_vm0, %v3461_v13  ;;  %v248_v11 = vsel %vm247_vm4, 0.0, %v3465_v10 }
 0x102   :  { %v146_v14 = vpop.permute.xlu0 %145 }
 0x103   :  { %vm148_vm1 = vcmp.eq.s32.totalorder %v138_v9, %v146_v14 }
 0x104   :  { %2757 = vmatmul.mubr.msk.f32.vlgmr.msra.gmra.mrb[0].mxu0 %vm148_vm1, %v3461_v13 }
 0x105   :  { %3066 = vmatpush3.bf16.msra.mxu0 %v3063_v6  ;;  %v251_v6 = vunpack.c.l.s4 %v3464_v5 }
 0x106   :  { %3068 = vmatprep.subr.bf16.mxu0 %v3067_v15 }
 0x107   :  { %v252_v8 = vunpack.c.0.s8 %v251_v6 }
 0x109   :  { %3070 = vmatpush3.bf16.msra.mxu0 %v3067_v15  ;;  %v255_v9 = vsub.s32 %v252_v8, %v3665_v47 }
 0x10a   :  { %3072 = vmatprep.subr.bf16.mxu0 %v3071_v18 }
 0x10b   :  { %v256_v12 = vrot.slane %v248_v11, %v255_v9 }
 0x10d   :  { %3074 = vmatpush3.bf16.msra.mxu0 %v3071_v18  ;;  %v264_v13 = vrot.slane %v256_v12, %v255_v9  ;;  %v257_v14 = vcombine.high %v256_v12, %v256_v12 }
 0x10e   :  { %3076 = vmatprep.subr.bf16.mxu0 %v3075_v21 }
 0x10f   :  { %v3715_v15 = vrot.slane %v264_v13, %v3668_v48  ;;  %v271_v16 = vrot.slane %v257_v14, %v255_v9 }
 0x111   :  { %3078 = vmatpush3.bf16.msra.mxu0 %v3075_v21  ;;  %v3719_v20 = vrot.slane %v271_v16, %v3668_v48 }
 0x112   :  { %3080 = vmatprep.subr.bf16.mxu0 %v3079_v24 }
 0x115   :  { %3082 = vmatpush3.bf16.msra.mxu0 %v3079_v24 }
 0x116   :  { %3084 = vmatprep.subr.bf16.mxu0 %v3083_v27 }
 0x119   :  { %3086 = vmatpush3.bf16.msra.mxu0 %v3083_v27 }
 0x11a   :  { %3088 = vmatprep.subr.bf16.mxu0 %v3087_v30 }
 0x11d   :  { %3090 = vmatpush3.bf16.msra.mxu0 %v3087_v30 }
 0x11e   :  { %3092 = vmatprep.subr.bf16.mxu0 %v3091_v39 }
 0x121   :  { %3094 = vmatpush3.bf16.msra.mxu0 %v3091_v39 }
 0x122   :  { %2859 = vmatprep.subr.mxu0 %v3462_v40 }
 0x1d7   :  { %v2758_v43 = vpop.f32.mrb[0].mxu0 }
 0x1d8   :  { %v237_v44 = vpop.f32.mrb[1].mxu0  ;;  %v3653_v46 = vadd.f32 %v2758_v43, %v170_v42 }
 0x1d9   :  { %v3651_v45 = vadd.f32 %v237_v44, %v169_v41 }
 0x1db   :  { %395 = vmatmul.mubr.f32.vlgmr.msra.gmra.mrb[0].mxu1 %v3651_v45  ;;  %2791 = vmatprep.mubr.f32.mxu0 %v3651_v45 }
 0x1dc   :  { %2792 = vmatmul.mubr.f32.vlgmr.msra.gmra.mrb[2].mxu0 %v3653_v46  ;;  %400 = vmatprep.mubr.f32.mxu1 %v3462_v40 }
 0x1dd   :  { %2861 = vmatprep.mubr.msk.f32.mxu0 %vm3463_vm2, %v3462_v40 }
 0x1df   :  { %401 = vmatmul.mubr.f32.gmra.mrb[2].mxu1 %v3653_v46 }
 0x1e0   :  { %2796 = vmatprep.mubr.msk.f32.mxu1 %vm3463_vm2, %v3462_v40 }
 0x2ae   :  { %v396_v55 = vpop.f32.mrb[0].mxu1 }
 0x2af   :  { %v486_v56 = vadd.f32 %v485_v52, %v396_v55  ;;  %v398_v57 = vpop.f32.mrb[1].mxu1  ;;  %v2793_v58 = vpop.f32.mrb[2].mxu0 }
 0x2b0   :  { %v3682_v59 = vadd.f32 %v493_v53, %v398_v57  ;;  %v3684_v60 = vadd.f32 %v2793_v58, %v499_v54  ;;  %v473_v61 = vpop.f32.mrb[3].mxu0 }
 0x2b1   :  { %v3688_v63 = vmul.f32 0.35355338, %v486_v56  ;;  %v3702_v4 = vadd.f32 %v499_v54, %v473_v61 }
 0x2b2   :  { %v402_v62 = vpop.f32.mrb[2].mxu1  ;;  %2795 = vmatpush3.xpose.msk.msra.mxu1 %vm502_vm3, %v3682_v59 }
 0x2b3   :  { %v487_v0 = vadd.f32 %v485_v52, %v402_v62  ;;  %v404_v1 = vpop.f32.mrb[3].mxu1  ;;  %2799 = vmatprep.subr.mxu1 %v3462_v40 }
 0x2b4   :  { %v3691_v2 = vadd.f32 %v493_v53, %v404_v1 }
 0x2b5   :  { %2797 = vmatmul.mubr.msk.f32.vlgmr.msra.gmra.mrb[4].mxu1 %vm502_vm3, %v3688_v63  ;;  %v3699_v3 = vmul.f32 0.35355338, %v487_v0 }
 0x2b6   :  { %2800 = vmatpush3.xpose.msk.msra.mxu1 %vm502_vm3, %v3691_v2  ;;  %2801 = vmatprep.mubr.msk.f32.mxu1 %vm3463_vm2, %v3462_v40 }
 0x2b7   :  { %2804 = vmatprep.subr.mxu1 %v3462_v40 }
 0x2b9   :  { %2802 = vmatmul.mubr.msk.f32.vlgmr.msra.gmra.mrb[6].mxu1 %vm502_vm3, %v3699_v3 }
 0x2ba   :  { %2805 = vmatpush3.msra.mxu1 %v3702_v4  ;;  %2806 = vmatprep.mubr.msk.f32.mxu1 %vm3463_vm2, %v3462_v40 }
 0x2bb   :  { %2809 = vmatprep.subr.mxu1 %v3462_v40 }
 0x388   :  { %v575_v17 = vpop.f32.mrb[4].mxu1 }
 0x389   :  { %v576_v18 = vadd.f32 %v575_v17, %v3715_v15  ;;  %v2798_v19 = vpop.f32.mrb[5].mxu1 }
 0x38b   :  { %v655_v21 = vsel %vm502_vm3, %v576_v18, -inf }
 0x38c   :  { %656 = vmax.xlane.f32.xlu1 %v655_v21  ;;  %v651_v22 = vpop.f32.mrb[6].mxu1 }
 0x38d   :  { %v652_v23 = vadd.f32 %v651_v22, %v3719_v20  ;;  %v2803_v24 = vpop.f32.mrb[7].mxu1 }
 0x38f   :  { %v658_v25 = vsel %vm502_vm3, %v652_v23, -inf }
 0x390   :  { %659 = vmax.xlane.f32.xlu1 %v658_v25 }
 0x3a1   :  { %825 = vrot.lane.b32.xlu1 %v3682_v59, %s3466_s0 }
 0x3a5   :  { %823 = vrot.lane.b32.xlu1 %v3688_v63, %s3466_s0 }
 0x3a9   :  { %903 = vrot.lane.b32.xlu1 %v3691_v2, %s3466_s0 }
 0x419   :  { %v657_v26 = vpop.xlane.xlu1 %656 }
 0x41a   :  { %v661_v27 = vsub.f32 %v576_v18, %v657_v26 }
 0x41c   :  { %v663_v28 = vmul.f32 1.442695, %v661_v27 }
 0x41d   :  { %v660_v29 = vpop.xlane.xlu1 %659 }
 0x41e   :  { %3219 = vpow2.f32 %v663_v28  ;;  %v662_v30 = vsub.f32 %v652_v23, %v660_v29  ;;  %v134_v28 = vld [vmem:[%s3931_s5 + $0x8] sm:$0xff]  ;;  %v133_v29 = vld [vmem:[%s3931_s5] sm:$0xff] }
 0x420   :  { %v665_v31 = vmul.f32 1.442695, %v662_v30 }
 0x421   :  { %v826_v36 = vpop.permute.xlu1 %825 }
 0x422   :  { %3221 = vpow2.f32 %v665_v31 }
 0x425   :  { %v824_v37 = vpop.permute.xlu1 %823 }
 0x428   :  { %v3220_v32 = vpop.eup %3219 }
 0x429   :  { %v667_v33 = vsel %vm502_vm3, %v3220_v32, 0.0  ;;  %v904_v38 = vpop.permute.xlu1 %903 }
 0x42a   :  { %668 = vadd.xlane.f32.xlu0 %v667_v33 }
 0x42c   :  { %v3222_v34 = vpop.eup %3221 }
 0x42d   :  { %v670_v35 = vsel %vm502_vm3, %v3222_v34, 0.0 }
 0x42e   :  { %671 = vadd.xlane.f32.xlu1 %v670_v35 }
 0x43f   :  { %901 = vrot.lane.b32.xlu1 %v3699_v3, %s3466_s0 }
 0x4b7   :  { %v669_v39 = vpop.xlane.xlu0 %668 }
 0x4b8   :  { %3223 = vrcp.f32 %v669_v39 }
 0x4bb   :  { %v672_v41 = vpop.xlane.xlu1 %671 }
 0x4bc   :  { %3225 = vrcp.f32 %v672_v41 }
 0x4bf   :  { %v902_v53 = vpop.permute.xlu1 %901 }
 0x4c2   :  { %v3224_v42 = vpop.eup %3223 }
 0x4c3   :  { %v675_v43 = vmul.f32 %v3224_v42, %v3220_v32 }
 0x4c5   :  { %2807 = vmatmul.mubr.msk.f32.vlgmr.msra.gmra.mrb[8].mxu1 %vm502_vm3, %v675_v43 }
 0x4c6   :  { %v3226_v44 = vpop.eup %3225  ;;  %2810 = vmatpush3.msra.mxu1 %v3684_v60  ;;  %2811 = vmatprep.mubr.msk.f32.mxu1 %vm3463_vm2, %v3462_v40 }
 0x4c7   :  { %v676_v52 = vmul.f32 %v3226_v44, %v3222_v34  ;;  %2814 = vmatprep.subr.mxu1 %v3462_v40 }
 0x4c9   :  { %2812 = vmatmul.mubr.msk.f32.vlgmr.msra.gmra.mrb[10].mxu1 %vm502_vm3, %v676_v52 }
 0x4ca   :  { %2816 = vmatprep.mubr.msk.f32.mxu1 %vm3463_vm2, %v3462_v40 }
 0x4cd   :  { %2815 = vmatpush3.xpose.msk.msra.mxu1 %vm502_vm3, %v826_v36 }
 0x4ce   :  { %2819 = vmatprep.subr.mxu1 %v3462_v40 }
 0x4d0   :  { %2817 = vmatmul.mubr.msk.f32.vlgmr.msra.gmra.mrb[12].mxu1 %vm502_vm3, %v824_v37 }
 0x4d1   :  { %2820 = vmatpush3.xpose.msk.msra.mxu1 %vm502_vm3, %v904_v38  ;;  %2821 = vmatprep.mubr.msk.f32.mxu1 %vm3463_vm2, %v3462_v40 }
 0x4d2   :  { %2824 = vmatprep.subr.mxu1 %v3462_v40 }
 0x4d4   :  { %2822 = vmatmul.mubr.msk.f32.vlgmr.msra.gmra.mrb[14].mxu1 %vm502_vm3, %v902_v53 }
 0x4d5   :  { %2826 = vmatprep.mubr.msk.f32.mxu1 %vm3463_vm2, %v3462_v40 }
 0x598   :  { %v3752_v54 = vpop.f32.mrb[8].mxu1 }
 0x599   :  { %v2808_v55 = vpop.f32.mrb[9].mxu1 }
 0x59c   :  { %v3754_v56 = vpop.f32.mrb[10].mxu1 }
 0x59d   :  { %v2813_v57 = vpop.f32.mrb[11].mxu1 }
 0x5a3   :  { %v897_v58 = vpop.f32.mrb[12].mxu1 }
 0x5a4   :  { %v898_v61 = vadd.f32 %v897_v58, %v3715_v15  ;;  %v2818_v62 = vpop.f32.mrb[13].mxu1 }
 0x5a6   :  { %v979_v0 = vsel %vm502_vm3, %v898_v61, -inf }
 0x5a7   :  { %980 = vmax.xlane.f32.xlu0 %v979_v0  ;;  %v975_v1 = vpop.f32.mrb[14].mxu1 }
 0x5a8   :  { %v976_v5 = vadd.f32 %v975_v1, %v3719_v20  ;;  %v2823_v6 = vpop.f32.mrb[15].mxu1 }
 0x5aa   :  { %v982_v7 = vsel %vm502_vm3, %v976_v5, -inf }
 0x5ab   :  { %983 = vmax.xlane.f32.xlu1 %v982_v7  ;;  %v135_v7 = vld [vmem:[%s3931_s5 + $0x10] sm:$0xff] }
 0x5bc   :  { %1317 = vrot.lane.b32.xlu1 %v3688_v63, %s3467_s19 }
 0x5bd   :  { %1002 = vrot.lane.b32.xlu0 %v3702_v4, %s3466_s0 }
 0x634   :  { %v981_v8 = vpop.xlane.xlu0 %980 }
 0x635   :  { %v985_v9 = vsub.f32 %v898_v61, %v981_v8 }
 0x637   :  { %v987_v10 = vmul.f32 1.442695, %v985_v9 }
 0x638   :  { %v1003_v11 = vpop.permute.xlu0 %1002  ;;  %v984_v12 = vpop.xlane.xlu1 %983 }
 0x639   :  { %3227 = vpow2.f32 %v987_v10  ;;  %v986_v13 = vsub.f32 %v976_v5, %v984_v12  ;;  %2825 = vmatpush3.msra.mxu1 %v1003_v11 }
 0x63a   :  { %2829 = vmatprep.subr.mxu1 %v3462_v40 }
 0x63b   :  { %v989_v14 = vmul.f32 1.442695, %v986_v13 }
 0x63c   :  { %v1318_v36 = vpop.permute.xlu1 %1317 }
 0x63d   :  { %3229 = vpow2.f32 %v989_v14 }
 0x643   :  { %v3228_v16 = vpop.eup %3227 }
 0x644   :  { %v991_v17 = vsel %vm502_vm3, %v3228_v16, 0.0 }
 0x645   :  { %992 = vadd.xlane.f32.xlu0 %v991_v17 }
 0x647   :  { %v3230_v18 = vpop.eup %3229 }
 0x648   :  { %v994_v19 = vsel %vm502_vm3, %v3230_v18, 0.0 }
 0x649   :  { %995 = vadd.xlane.f32.xlu0 %v994_v19 }
 0x65f   :  { %1079 = vrot.lane.b32.xlu0 %v3684_v60, %s3466_s0 }
 0x663   :  { %1319 = vrot.lane.b32.xlu0 %v3682_v59, %s3467_s19 }
 0x667   :  { %1397 = vrot.lane.b32.xlu0 %v3691_v2, %s3467_s19 }
 0x66b   :  { %1395 = vrot.lane.b32.xlu0 %v3699_v3, %s3467_s19 }
 0x6d2   :  { %v993_v21 = vpop.xlane.xlu0 %992 }
 0x6d3   :  { %3231 = vrcp.f32 %v993_v21 }
 0x6d6   :  { %v996_v22 = vpop.xlane.xlu0 %995 }
 0x6d7   :  { %3233 = vrcp.f32 %v996_v22 }
 0x6da   :  { %v1080_v25 = vpop.permute.xlu0 %1079 }
 0x6dd   :  { %v3232_v23 = vpop.eup %3231 }
 0x6de   :  { %v999_v24 = vmul.f32 %v3232_v23, %v3228_v16  ;;  %v1320_v34 = vpop.permute.xlu0 %1319 }
 0x6e0   :  { %2827 = vmatmul.mubr.msk.f32.vlgmr.msra.gmra.mrb[16].mxu1 %vm502_vm3, %v999_v24 }
 0x6e1   :  { %v3234_v26 = vpop.eup %3233  ;;  %2830 = vmatpush3.msra.mxu1 %v1080_v25  ;;  %2831 = vmatprep.mubr.msk.f32.mxu1 %vm3463_vm2, %v3462_v40 }
 0x6e2   :  { %v1000_v27 = vmul.f32 %v3234_v26, %v3230_v18  ;;  %2834 = vmatprep.subr.mxu1 %v134_v28  ;;  %v1398_v35 = vpop.permute.xlu0 %1397 }
 0x6e4   :  { %2832 = vmatmul.mubr.msk.f32.vlgmr.msra.gmra.mrb[18].mxu1 %vm502_vm3, %v1000_v27 }
 0x6e5   :  { %2835 = vmatpush3.msra.mxu1 %v134_v28 }
 0x6e6   :  { %2839 = vmatprep.subr.mxu1 %v133_v29  ;;  %v1396_v37 = vpop.permute.xlu0 %1395 }
 0x7b3   :  { %v1074_v30 = vpop.f32.mrb[16].mxu1 }
 0x7b4   :  { %v2828_v31 = vpop.f32.mrb[17].mxu1  ;;  %2836 = vmatprep.mubr.msk.f32.mxu1 %vm502_vm3, %v1074_v30 }
 0x7b7   :  { %v1151_v32 = vpop.f32.mrb[18].mxu1 }
 0x7b8   :  { %v2833_v33 = vpop.f32.mrb[19].mxu1  ;;  %2837 = vmatmul.mubr.msk.f32.vlgmr.msra.gmra.mrb[20].mxu1 %vm502_vm3, %v1151_v32 }
 0x7b9   :  { %2840 = vmatpush3.msra.mxu1 %v133_v29  ;;  %2841 = vmatprep.mubr.msk.f32.mxu1 %vm502_vm3, %v3752_v54 }
 0x7ba   :  { %2844 = vmatprep.subr.mxu1 %v3462_v40 }
 0x7c0   :  { %2842 = vmatmul.mubr.msk.f32.vlgmr.msra.gmra.mrb[20].mxu1 %vm502_vm3, %v3754_v56 }
 0x7c1   :  { %2845 = vmatpush3.xpose.msk.msra.mxu1 %vm502_vm3, %v1320_v34  ;;  %2846 = vmatprep.mubr.msk.f32.mxu1 %vm3463_vm2, %v3462_v40 }
 0x7c2   :  { %2849 = vmatprep.subr.mxu1 %v3462_v40 }
 0x7c4   :  { %2847 = vmatmul.mubr.msk.f32.vlgmr.msra.gmra.mrb[22].mxu1 %vm502_vm3, %v1318_v36 }
 0x7c5   :  { %2850 = vmatpush3.xpose.msk.msra.mxu1 %vm502_vm3, %v1398_v35  ;;  %2851 = vmatprep.mubr.msk.f32.mxu1 %vm3463_vm2, %v3462_v40 }
 0x7c6   :  { %2854 = vmatprep.subr.mxu1 %v3462_v40 }
 0x7c8   :  { %2852 = vmatmul.mubr.msk.f32.vlgmr.msra.gmra.mrb[24].mxu1 %vm502_vm3, %v1396_v37 }
 0x7c9   :  { %2856 = vmatprep.mubr.msk.f32.mxu1 %vm3463_vm2, %v3462_v40 }
 0x897   :  { %v1391_v38 = vpop.f32.mrb[22].mxu1 }
 0x898   :  { %v1392_v39 = vadd.f32 %v1391_v38, %v3715_v15  ;;  %v2848_v41 = vpop.f32.mrb[23].mxu1 }
 0x899   :  { %v136_v41 = vld [vmem:[%s3931_s5 + $0x18] sm:$0xff]  ;;  %s3469_s5 = smov [#allocation14]  }
 0x89a   :  { %v1473_v42 = vsel %vm502_vm3, %v1392_v39, -inf  ;;  %s2539_s30 = sshll.u32 %s3469_s5, 4  ;;  %s2540_s30 = int_to_ptr.vmem [resolvable:$true] %s2539_s30 }
 0x89b   :  { %1474 = vmax.xlane.f32.xlu0 %v1473_v42  ;;  %v1469_v43 = vpop.f32.mrb[24].mxu1  ;;  %s3417_s11 = scalar_lea.vmem %s2540_s30, 256  ;;  %p3422_p1 = scmp.lt.s32.totalorder %s2540_s30, %s2540_s30 }
 0x89c   :  { %v1470_v44 = vadd.f32 %v1469_v43, %v3719_v20  ;;  %v2853_v52 = vpop.f32.mrb[25].mxu1  ;;  %p3418_p0 = scmp.ne.s32.totalorder %s2540_s30, %s3417_s11  ;;  %p3423_p2 = scmp.lt.s32.totalorder %s3417_s11, %s3417_s11 }
 0x89e   :  { %v1476_v53 = vsel %vm502_vm3, %v1470_v44, -inf  ;;  %p3424_p3 = por %p3423_p2, %p3422_p1 }
 0x89f   :  { %1477 = vmax.xlane.f32.xlu1 %v1476_v53 }
 0x8a0   :  { %p3425_p4 = pnand %p3424_p3, %p3418_p0 }
 0x8b0   :  { %1571 = vrot.lane.b32.xlu1 %v3684_v60, %s3467_s19 }
 0x8b4   :  { %1732 = vrot.lane.b32.xlu1 %v3682_v59, %s3468_s27 }
 0x8b8   :  { %1730 = vrot.lane.b32.xlu1 %v3688_v63, %s3468_s27 }
 0x928   :  { %v1475_v54 = vpop.xlane.xlu0 %1474 }
 0x929   :  { %v1479_v55 = vsub.f32 %v1392_v39, %v1475_v54 }
 0x92b   :  { %v1481_v56 = vmul.f32 1.442695, %v1479_v55  ;;  %v2189_v55 = vld [vmem:[#allocation8] sm:$0xff] }
 0x92c   :  { %v1478_v57 = vpop.xlane.xlu1 %1477 }
 0x92d   :  { %3235 = vpow2.f32 %v1481_v56  ;;  %v1480_v58 = vsub.f32 %v1470_v44, %v1478_v57  ;;  %v2190_v56 = vld [vmem:[#allocation8 + $0x8] sm:$0xff] }
 0x92e   :  { %v3095_v57 = vpack.c.bf16 %v2190_v56, %v2189_v55 }
 0x92f   :  { %v1483_v61 = vmul.f32 1.442695, %v1480_v58  ;;  %v2145_v58 = vsub.s32 3, %v3665_v47 }
 0x930   :  { %v1572_v62 = vpop.permute.xlu1 %1571 }
 0x931   :  { %3237 = vpow2.f32 %v1483_v61  ;;  %2860 = vmatpush3.msra.mxu0 %v1572_v62  ;;  %v2146_v61 = vrot.slane %v3670_v49, %v2145_v58  ;;  %v2302_v58 = vld [vmem:[#allocation10] sm:$0xff] }
 0x932   :  { %2869 = vmatprep.subr.mxu0 %v3462_v40 }
 0x937   :  { %v3236_v0 = vpop.eup %3235 }
 0x938   :  { %v1485_v1 = vsel %vm502_vm3, %v3236_v0, 0.0 }
 0x939   :  { %1486 = vadd.xlane.f32.xlu0 %v1485_v1 }
 0x93b   :  { %v3238_v59 = vpop.eup %3237 }
 0x93c   :  { %v1488_v5 = vsel %vm502_vm3, %v3238_v59, 0.0 }
 0x93d   :  { %1489 = vadd.xlane.f32.xlu0 %v1488_v5 }
 0x953   :  { %1495 = vrot.lane.b32.xlu0 %v3702_v4, %s3467_s19 }
 0x957   :  { %1810 = vrot.lane.b32.xlu0 %v3691_v2, %s3468_s27  ;;  %v1733_v2 = vpop.permute.xlu1 %1732 }
 0x95b   :  { %1808 = vrot.lane.b32.xlu0 %v3699_v3, %s3468_s27  ;;  %v1731_v3 = vpop.permute.xlu1 %1730 }
 0x9c6   :  { %v1487_v63 = vpop.xlane.xlu0 %1486 }
 0x9c7   :  { %3239 = vrcp.f32 %v1487_v63 }
 0x9ca   :  { %v1490_v6 = vpop.xlane.xlu0 %1489 }
 0x9cb   :  { %3241 = vrcp.f32 %v1490_v6 }
 0x9ce   :  { %v1496_v8 = vpop.permute.xlu0 %1495 }
 0x9cf   :  { %2855 = vmatpush3.msra.mxu1 %v1496_v8  ;;  %v2191_v8 = vld [vmem:[#allocation8 + $0x10] sm:$0xff] }
 0x9d0   :  { %2864 = vmatprep.subr.mxu1 %v135_v7 }
 0x9d1   :  { %v3240_v9 = vpop.eup %3239 }
 0x9d2   :  { %v1493_v10 = vmul.f32 %v3240_v9, %v3236_v0  ;;  %v1811_v16 = vpop.permute.xlu0 %1810  ;;  %v2192_v9 = vld [vmem:[#allocation8 + $0x18] sm:$0xff] }
 0x9d4   :  { %2857 = vmatmul.mubr.msk.f32.vlgmr.msra.gmra.mrb[26].mxu1 %vm502_vm3, %v1493_v10  ;;  %v3099_v10 = vpack.c.bf16 %v2192_v9, %v2191_v8  ;;  %v2309_v8 = vld [vmem:[#allocation10 + $0x38] sm:$0xff] }
 0x9d5   :  { %v3242_v11 = vpop.eup %3241  ;;  %2865 = vmatpush3.msra.mxu1 %v135_v7 }
 0x9d6   :  { %v1494_v12 = vmul.f32 %v3242_v11, %v3238_v59  ;;  %2874 = vmatprep.subr.mxu1 %v3462_v40  ;;  %v1809_v19 = vpop.permute.xlu0 %1808 }
 0x9d8   :  { %2862 = vmatmul.mubr.msk.f32.vlgmr.msra.gmra.mrb[4].mxu0 %vm502_vm3, %v1494_v12  ;;  %v2196_v12 = vld [vmem:[#allocation8 + $0x38] sm:$0xff] }
 0x9d9   :  { %2870 = vmatpush3.xpose.msk.msra.mxu0 %vm502_vm3, %v1733_v2  ;;  %2871 = vmatprep.mubr.msk.f32.mxu0 %vm3463_vm2, %v3462_v40  ;;  %v2195_v2 = vld [vmem:[#allocation8 + $0x30] sm:$0xff] }
 0x9da   :  { %2879 = vmatprep.subr.mxu0 %v3462_v40 }
 0x9dc   :  { %2872 = vmatmul.mubr.msk.f32.vlgmr.msra.gmra.mrb[6].mxu0 %vm502_vm3, %v1731_v3  ;;  %v3107_v3 = vpack.c.bf16 %v2196_v12, %v2195_v2  ;;  %v2313_v2 = vld [vmem:[#allocation10 + $0x58] sm:$0xff] }
 0x9dd   :  { %2881 = vmatprep.mubr.msk.f32.mxu0 %vm3463_vm2, %v3462_v40 }
 0xaa7   :  { %v1567_v13 = vpop.f32.mrb[26].mxu1 }
 0xaa8   :  { %v2858_v14 = vpop.f32.mrb[27].mxu1  ;;  %2866 = vmatprep.mubr.msk.f32.mxu1 %vm502_vm3, %v1567_v13  ;;  %v2197_v13 = vld [vmem:[#allocation8 + $0x40] sm:$0xff] }
 0xaa9   :  { %v2198_v14 = vld [vmem:[#allocation8 + $0x48] sm:$0xff] }
 0xaab   :  { %v1643_v17 = vpop.f32.mrb[4].mxu0 }
 0xaac   :  { %v2863_v18 = vpop.f32.mrb[5].mxu0  ;;  %2867 = vmatmul.mubr.msk.f32.vlgmr.msra.gmra.mrb[20].mxu1 %vm502_vm3, %v1643_v17  ;;  %v2199_v17 = vld [vmem:[#allocation8 + $0x50] sm:$0xff] }
 0xaad   :  { %2875 = vmatpush3.xpose.msk.msra.mxu1 %vm502_vm3, %v1811_v16  ;;  %2876 = vmatprep.mubr.msk.f32.mxu1 %vm3463_vm2, %v3462_v40  ;;  %v3111_v16 = vpack.c.bf16 %v2198_v14, %v2197_v13  ;;  %v2200_v18 = vld [vmem:[#allocation8 + $0x58] sm:$0xff]  ;;  %v2315_v13 = vld [vmem:[#allocation10 + $0x68] sm:$0xff] }
 0xaae   :  { %2884 = vmatprep.subr.mxu1 %v3462_v40 }
 0xaaf   :  { %v1804_v21 = vpop.f32.mrb[6].mxu0 }
 0xab0   :  { %v1805_v22 = vadd.f32 %v1804_v21, %v3715_v15  ;;  %v2873_v23 = vpop.f32.mrb[7].mxu0  ;;  %2877 = vmatmul.mubr.msk.f32.vlgmr.msra.gmra.mrb[28].mxu1 %vm502_vm3, %v1809_v19  ;;  %v3115_v19 = vpack.c.bf16 %v2200_v18, %v2199_v17  ;;  %v2201_v21 = vld [vmem:[#allocation8 + $0x60] sm:$0xff]  ;;  %v2317_v17 = vld [vmem:[#allocation10 + $0x78] sm:$0xff] }
 0xab1   :  { %2886 = vmatprep.mubr.msk.f32.mxu1 %vm3463_vm2, %v3462_v40 }
 0xab2   :  { %v1886_v24 = vsel %vm502_vm3, %v1805_v22, -inf }
 0xab3   :  { %1887 = vmax.xlane.f32.xlu1 %v1886_v24  ;;  %v2203_v24 = vld [vmem:[#allocation8 + $0x70] sm:$0xff] }
 0xb40   :  { %v1888_v25 = vpop.xlane.xlu1 %1887 }
 0xb41   :  { %v1892_v26 = vsub.f32 %v1805_v22, %v1888_v25  ;;  %v2202_v22 = vld [vmem:[#allocation8 + $0x68] sm:$0xff]  ;;  %v2204_v25 = vld [vmem:[#allocation8 + $0x78] sm:$0xff] }
 0xb42   :  { %v3119_v23 = vpack.c.bf16 %v2202_v22, %v2201_v21 }
 0xb43   :  { %v1894_v27 = vmul.f32 1.442695, %v1892_v26  ;;  %v3123_v26 = vpack.c.bf16 %v2204_v25, %v2203_v24 }
 0xb45   :  { %3243 = vpow2.f32 %v1894_v27 }
 0xb4f   :  { %v3244_v15 = vpop.eup %3243 }
 0xb50   :  { %v1898_v32 = vsel %vm502_vm3, %v3244_v15, 0.0 }
 0xb83   :  { %v1882_v28 = vpop.f32.mrb[28].mxu1 }
 0xb84   :  { %v1883_v29 = vadd.f32 %v1882_v28, %v3719_v20  ;;  %v2878_v30 = vpop.f32.mrb[29].mxu1 }
 0xb86   :  { %v1889_v31 = vsel %vm502_vm3, %v1883_v29, -inf }
 0xb87   :  { %1890 = vmax.xlane.f32.xlu0 %v1889_v31 }
 0xb8b   :  { %1899 = vadd.xlane.f32.xlu0 %v1898_v32 }
 0xba1   :  { %1908 = vrot.lane.b32.xlu0 %v3702_v4, %s3468_s27 }
 0xc14   :  { %v1891_v40 = vpop.xlane.xlu0 %1890 }
 0xc15   :  { %v1893_v33 = vsub.f32 %v1883_v29, %v1891_v40 }
 0xc17   :  { %v1896_v34 = vmul.f32 1.442695, %v1893_v33 }
 0xc18   :  { %v1900_v35 = vpop.xlane.xlu0 %1899 }
 0xc19   :  { %3245 = vpow2.f32 %v1896_v34 }
 0xc1a   :  { %3247 = vrcp.f32 %v1900_v35 }
 0xc1c   :  { %v1909_v36 = vpop.permute.xlu0 %1908 }
 0xc1d   :  { %2880 = vmatpush3.msra.mxu0 %v1909_v36 }
 0xc1e   :  { %3096 = vmatprep.subr.bf16.mxu0 %v3095_v57 }
 0xc23   :  { %v3246_v20 = vpop.eup %3245 }
 0xc24   :  { %v3248_v37 = vpop.eup %3247  ;;  %v1901_v38 = vsel %vm502_vm3, %v3246_v20, 0.0 }
 0xc25   :  { %v1906_v39 = vmul.f32 %v3248_v37, %v3244_v15  ;;  %1902 = vadd.xlane.f32.xlu1 %v1901_v38  ;;  %v2179_v38 = vsub.s32 4, %v3665_v47 }
 0xc27   :  { %2882 = vmatmul.mubr.msk.f32.vlgmr.msra.gmra.mrb[8].mxu0 %vm502_vm3, %v1906_v39  ;;  %v2185_v39 = vsub.s32 5, %v3665_v47 }
 0xc28   :  { %3098 = vmatpush3.bf16.msra.mxu0 %v3095_v57 }
 0xc29   :  { %3100 = vmatprep.subr.bf16.mxu0 %v3099_v10 }
 0xc2c   :  { %3102 = vmatpush3.bf16.msra.mxu0 %v3099_v10  ;;  %v2310_v10 = vld [vmem:[#allocation10 + $0x40] sm:$0xff] }
 0xc36   :  { %1984 = vrot.lane.b32.xlu1 %v3684_v60, %s3468_s27 }
 0xcb2   :  { %v1903_v4 = vpop.xlane.xlu1 %1902 }
 0xcb3   :  { %3249 = vrcp.f32 %v1903_v4 }
 0xcb6   :  { %v1985_v42 = vpop.permute.xlu1 %1984 }
 0xcb7   :  { %2885 = vmatpush3.msra.mxu1 %v1985_v42 }
 0xcb8   :  { %2889 = vmatprep.subr.mxu1 %v136_v41 }
 0xcbd   :  { %v3250_v43 = vpop.eup %3249 }
 0xcbe   :  { %v1907_v44 = vmul.f32 %v3250_v43, %v3246_v20 }
 0xcc0   :  { %2887 = vmatmul.mubr.msk.f32.vlgmr.msra.gmra.mrb[30].mxu1 %vm502_vm3, %v1907_v44 }
 0xcc1   :  { %2890 = vmatpush3.msra.mxu1 %v136_v41  ;;  %v2180_v41 = vrot.slane %v3670_v49, %v2179_v38 }
 0xcfa   :  { %v1980_v52 = vpop.f32.mrb[8].mxu0 }
 0xcfb   :  { %v2883_v53 = vpop.f32.mrb[9].mxu0  ;;  %2891 = vmatprep.mubr.msk.f32.mxu1 %vm502_vm3, %v1980_v52 }
 0xcfc   :  { %v2186_v53 = vrot.slane %v3670_v49, %v2185_v39 }
 0xd93   :  { %v2056_v54 = vpop.f32.mrb[30].mxu1 }
 0xd94   :  { %v2888_v60 = vpop.f32.mrb[31].mxu1  ;;  %2892 = vmatmul.mubr.msk.f32.vlgmr.msra.gmra.mrb[20].mxu1 %vm502_vm3, %v2056_v54 }
 0xe67   :  { %v2893_v62 = vpop.f32.mrb[20].mxu1 }
 0xe68   :  { %v2148_v0 = vadd.f32 %v2893_v62, %v2146_v61  ;;  %v2132_v1 = vpop.f32.mrb[21].mxu1 }
 0xe69   :  { %v2147_v59 = vadd.f32 %v2146_v61, %v2132_v1  ;;  %v2303_v61 = vld [vmem:[#allocation10 + $0x8] sm:$0xff]  ;;  %v2305_v1 = vld [vmem:[#allocation10 + $0x18] sm:$0xff] }
 0xe6a   :  { %v3865_v5 = vadd.f32 %v2148_v0, %v3653_v46  ;;  %v2193_v46 = vld [vmem:[#allocation8 + $0x20] sm:$0xff]  ;;  %v3127_v62 = vpack.c.bf16 %v2303_v61, %v2302_v58  ;;  %v2304_v0 = vld [vmem:[#allocation10 + $0x10] sm:$0xff] }
 0xe6b   :  { %v3868_v63 = vadd.f32 %v2147_v59, %v3651_v45  ;;  %v2194_v45 = vld [vmem:[#allocation8 + $0x28] sm:$0xff]  ;;  %v3131_v59 = vpack.c.bf16 %v2305_v1, %v2304_v0  ;;  %v2439_v0 = vld [vmem:[#allocation11 + $0x10] sm:$0xff]  ;;  %v2440_v1 = vld [vmem:[#allocation11 + $0x18] sm:$0xff] }
 0xe6c   :  { %2153 = vadd.xlane.f32.xlu0 %v3865_v5  ;;  %v2158_v7 = vmul.f32 %v3865_v5, %v3865_v5  ;;  %v3103_v11 = vpack.c.bf16 %v2194_v45, %v2193_v46  ;;  %3128 = vmatprep.subr.bf16.mxu1 %v3127_v62  ;;  %v2311_v46 = vld [vmem:[#allocation10 + $0x48] sm:$0xff]  ;;  %v2312_v45 = vld [vmem:[#allocation10 + $0x50] sm:$0xff] }
 0xe6d   :  { %2151 = vadd.xlane.f32.xlu1 %v3868_v63  ;;  %v2157_v6 = vmul.f32 %v3868_v63, %v3868_v63  ;;  %3130 = vmatpush3.bf16.msra.mxu1 %v3127_v62  ;;  %v3147_v12 = vpack.c.bf16 %v2313_v2, %v2312_v45  ;;  %v2448_v45 = vld [vmem:[#allocation11 + $0x58] sm:$0xff]  ;;  %v2449_v2 = vld [vmem:[#allocation11 + $0x60] sm:$0xff] }
 0xe6e   :  { %3104 = vmatprep.subr.bf16.mxu0 %v3103_v11  ;;  %3132 = vmatprep.subr.bf16.mxu1 %v3131_v59 }
 0xe6f   :  { %3106 = vmatpush3.bf16.msra.mxu0 %v3103_v11  ;;  %v3143_v11 = vpack.c.bf16 %v2311_v46, %v2310_v10  ;;  %v2447_v10 = vld [vmem:[#allocation11 + $0x50] sm:$0xff] }
 0xe70   :  { %2159 = vadd.xlane.f32.xlu0 %v2157_v6  ;;  %3108 = vmatprep.subr.bf16.mxu0 %v3107_v3 }
 0xe71   :  { %2161 = vadd.xlane.f32.xlu1 %v2158_v7  ;;  %3134 = vmatpush3.bf16.msra.mxu1 %v3131_v59  ;;  %v2308_v7 = vld [vmem:[#allocation10 + $0x30] sm:$0xff]  ;;  %v3163_v59 = vpack.c.bf16 %v2440_v1, %v2439_v0 }
 0xe72   :  { %v3139_v9 = vpack.c.bf16 %v2309_v8, %v2308_v7  ;;  %v2445_v8 = vld [vmem:[#allocation11 + $0x40] sm:$0xff] }
 0xe73   :  { %3110 = vmatpush3.bf16.msra.mxu0 %v3107_v3  ;;  %v2314_v3 = vld [vmem:[#allocation10 + $0x60] sm:$0xff] }
 0xe74   :  { %3112 = vmatprep.subr.bf16.mxu0 %v3111_v16  ;;  %v3151_v14 = vpack.c.bf16 %v2315_v13, %v2314_v3  ;;  %v2451_v13 = vld [vmem:[#allocation11 + $0x70] sm:$0xff] }
 0xe77   :  { %3114 = vmatpush3.bf16.msra.mxu0 %v3111_v16  ;;  %v2316_v16 = vld [vmem:[#allocation10 + $0x70] sm:$0xff] }
 0xe78   :  { %3116 = vmatprep.subr.bf16.mxu0 %v3115_v19  ;;  %v3155_v18 = vpack.c.bf16 %v2317_v17, %v2316_v16 }
 0xe7b   :  { %3118 = vmatpush3.bf16.msra.mxu0 %v3115_v19  ;;  %v2207_v19 = vsub.s32 6, %v3665_v47 }
 0xe7c   :  { %3120 = vmatprep.subr.bf16.mxu0 %v3119_v23 }
 0xe7d   :  { %v2208_v21 = vrot.slane %v3670_v49, %v2207_v19 }
 0xe7f   :  { %3122 = vmatpush3.bf16.msra.mxu0 %v3119_v23 }
 0xe80   :  { %3124 = vmatprep.subr.bf16.mxu0 %v3123_v26 }
 0xe83   :  { %3126 = vmatpush3.bf16.msra.mxu0 %v3123_v26 }
 0xef9   :  { %v2154_v27 = vpop.xlane.xlu0 %2153 }
 0xefa   :  { %v2152_v28 = vpop.xlane.xlu1 %2151  ;;  %v2156_v29 = vmul.f32 0.03125, %v2154_v27 }
 0xefb   :  { %v2155_v30 = vmul.f32 0.03125, %v2152_v28 }
 0xefc   :  { %v2166_v33 = vmul.f32 %v2156_v29, %v2156_v29  ;;  %v2170_v43 = vsub.f32 %v3865_v5, %v2156_v29  ;;  %v2306_v5 = vld [vmem:[#allocation10 + $0x20] sm:$0xff] }
 0xefd   :  { %v2165_v31 = vmul.f32 %v2155_v30, %v2155_v30  ;;  %v2160_v15 = vpop.xlane.xlu0 %2159  ;;  %v2169_v4 = vsub.f32 %v3868_v63, %v2155_v30  ;;  %v2307_v63 = vld [vmem:[#allocation10 + $0x28] sm:$0xff] }
 0xefe   :  { %v2163_v32 = vmul.f32 0.03125, %v2160_v15  ;;  %v2162_v40 = vpop.xlane.xlu1 %2161  ;;  %v3135_v6 = vpack.c.bf16 %v2307_v63, %v2306_v5  ;;  %v2443_v63 = vld [vmem:[#allocation11 + $0x30] sm:$0xff] }
 0xeff   :  { %v2164_v34 = vmul.f32 0.03125, %v2162_v40 }
 0xf00   :  { %v2167_v35 = vsub.f32 %v2163_v32, %v2165_v31  ;;  %3136 = vmatprep.subr.bf16.mxu1 %v3135_v6 }
 0xf01   :  { %v2168_v36 = vsub.f32 %v2164_v34, %v2166_v33  ;;  %3138 = vmatpush3.bf16.msra.mxu1 %v3135_v6  ;;  %v2444_v6 = vld [vmem:[#allocation11 + $0x38] sm:$0xff] }
 0xf02   :  { %v2171_v20 = vadd.f32 1e-05, %v2167_v35  ;;  %3140 = vmatprep.subr.bf16.mxu1 %v3139_v9  ;;  %v3171_v7 = vpack.c.bf16 %v2444_v6, %v2443_v63 }
 0xf03   :  { %v2172_v37 = vadd.f32 1e-05, %v2168_v36 }
 0xf04   :  { %3251 = vrsqrt.f32 %v2171_v20 }
 0xf05   :  { %3253 = vrsqrt.f32 %v2172_v37  ;;  %3142 = vmatpush3.bf16.msra.mxu1 %v3139_v9  ;;  %v2446_v9 = vld [vmem:[#allocation11 + $0x48] sm:$0xff] }
 0xf06   :  { %3144 = vmatprep.subr.bf16.mxu1 %v3143_v11  ;;  %v3175_v46 = vpack.c.bf16 %v2446_v9, %v2445_v8 }
 0xf09   :  { %3146 = vmatpush3.bf16.msra.mxu1 %v3143_v11  ;;  %v3179_v11 = vpack.c.bf16 %v2448_v45, %v2447_v10 }
 0xf0a   :  { %3148 = vmatprep.subr.bf16.mxu1 %v3147_v12 }
 0xf0d   :  { %3150 = vmatpush3.bf16.msra.mxu1 %v3147_v12  ;;  %v2450_v12 = vld [vmem:[#allocation11 + $0x68] sm:$0xff] }
 0xf0e   :  { %v3252_v42 = vpop.eup %3251  ;;  %3152 = vmatprep.subr.bf16.mxu1 %v3151_v14  ;;  %v3183_v3 = vpack.c.bf16 %v2450_v12, %v2449_v2 }
 0xf0f   :  { %v3254_v44 = vpop.eup %3253  ;;  %v2175_v52 = vmul.f32 %v3252_v42, %v2169_v4  ;;  %v2438_v42 = vld [vmem:[#allocation11 + $0x8] sm:$0xff] }
 0xf10   :  { %v2176_v54 = vmul.f32 %v3254_v44, %v2170_v43  ;;  %v2320_v44 = vsub.s32 7, %v3665_v47 }
 0xf11   :  { %v2181_v60 = vmul.f32 %v2180_v41, %v2175_v52  ;;  %3154 = vmatpush3.bf16.msra.mxu1 %v3151_v14  ;;  %v2452_v14 = vld [vmem:[#allocation11 + $0x78] sm:$0xff] }
 0xf12   :  { %v2182_v55 = vmul.f32 %v2180_v41, %v2176_v54  ;;  %3156 = vmatprep.subr.bf16.mxu1 %v3155_v18  ;;  %v2437_v41 = vld [vmem:[#allocation11] sm:$0xff]  ;;  %v2321_v52 = vrot.slane %v3670_v49, %v2320_v44  ;;  %v3187_v16 = vpack.c.bf16 %v2452_v14, %v2451_v13 }
 0xf13   :  { %v3882_v56 = vadd.f32 %v2186_v53, %v2181_v60  ;;  %v3159_v43 = vpack.c.bf16 %v2438_v42, %v2437_v41 }
 0xf14   :  { %v3884_v57 = vadd.f32 %v2186_v53, %v2182_v55 }
 0xf15   :  { %2926 = vmatprep.mubr.f32.mxu0 %v3882_v56  ;;  %3158 = vmatpush3.bf16.msra.mxu1 %v3155_v18 }
 0xf16   :  { %2927 = vmatmul.mubr.f32.vlgmr.msra.gmra.mrb[10].mxu0 %v3884_v57  ;;  %3160 = vmatprep.subr.bf16.mxu0 %v3159_v43 }
 0xf17   :  { %3162 = vmatpush3.bf16.msra.mxu0 %v3159_v43 }
 0xf18   :  { %3164 = vmatprep.subr.bf16.mxu0 %v3163_v59 }
 0xf1b   :  { %3166 = vmatpush3.bf16.msra.mxu0 %v3163_v59 }
 0xfe9   :  { %v2928_v22 = vpop.f32.mrb[10].mxu0 }
 0xfea   :  { %v2281_v23 = vadd.f32 %v2928_v22, %v2208_v21  ;;  %v2275_v24 = vpop.f32.mrb[11].mxu0 }
 0xfeb   :  { %v2276_v25 = vadd.f32 %v2275_v24, %v2208_v21 }
 0xfec   :  { %v2285_v26 = vmul.f32 %v2281_v23, %v2281_v23 }
 0xfed   :  { %v2284_v27 = vmul.f32 %v2276_v25, %v2276_v25 }
 0xfee   :  { %v2287_v28 = vmul.f32 %v2285_v26, %v2281_v23 }
 0xfef   :  { %v2286_v29 = vmul.f32 %v2284_v27, %v2276_v25 }
 0xff0   :  { %v2289_v30 = vmul.f32 0.044715, %v2287_v28 }
 0xff1   :  { %v2288_v31 = vmul.f32 0.044715, %v2286_v29 }
 0xff2   :  { %v2291_v15 = vadd.f32 %v2289_v30, %v2281_v23 }
 0xff3   :  { %v2290_v32 = vadd.f32 %v2288_v31, %v2276_v25 }
 0xff4   :  { %v2293_v40 = vmul.f32 0.7978846, %v2291_v15  ;;  %v132_v15 = vld [vmem:[#allocation13 + $0x8] sm:$0xff] }
 0xff5   :  { %v2292_v33 = vmul.f32 0.7978846, %v2290_v32  ;;  %v2456_v42 = vrot.slane %v132_v15, %v498_v51 }
 0xff6   :  { %3255 = vtanh.f32 %v2293_v40  ;;  %v2428_v40 = vrot.slane %v132_v15, %v3668_v48 }
 0xff7   :  { %3257 = vtanh.f32 %v2292_v33 }
0x1000   :  { %v3256_v34 = vpop.eup %3255 }
0x1001   :  { %v3258_v35 = vpop.eup %3257  ;;  %v2297_v36 = vadd.f32 1.0, %v3256_v34 }
0x1002   :  { %v2296_v20 = vadd.f32 1.0, %v3258_v35 }
0x1003   :  { %v2299_v37 = vmul.f32 0.5, %v2297_v36 }
0x1004   :  { %v2298_v38 = vmul.f32 0.5, %v2296_v20 }
0x1005   :  { %v2301_v4 = vmul.f32 %v2299_v37, %v2281_v23  ;;  %v2434_v37 = vrot.slane %v132_v15, %v492_v50 }
0x1006   :  { %v2300_v39 = vmul.f32 %v2298_v38, %v2276_v25 }
0x1008   :  { %2961 = vmatprep.mubr.f32.mxu1 %v2300_v39 }
0x1009   :  { %2962 = vmatmul.mubr.f32.vlgmr.msra.gmra.mrb[32].mxu1 %v2301_v4 }
0x10dc   :  { %v2963_v53 = vpop.f32.mrb[32].mxu1 }
0x10dd   :  { %v2394_v54 = vadd.f32 %v2963_v53, %v2321_v52  ;;  %v2388_v60 = vpop.f32.mrb[33].mxu1 }
0x10de   :  { %v2389_v55 = vadd.f32 %v2388_v60, %v2321_v52 }
0x10df   :  { %v3893_v58 = vadd.f32 %v2394_v54, %v3884_v57  ;;  %v2441_v57 = vld [vmem:[#allocation11 + $0x20] sm:$0xff] }
0x10e0   :  { %v3896_v61 = vadd.f32 %v2389_v55, %v3882_v56  ;;  %v2442_v56 = vld [vmem:[#allocation11 + $0x28] sm:$0xff] }
0x10e1   :  { %2401 = vadd.xlane.f32.xlu1 %v3893_v58  ;;  %v2406_v62 = vmul.f32 %v3893_v58, %v3893_v58  ;;  %v3167_v5 = vpack.c.bf16 %v2442_v56, %v2441_v57 }
0x10e2   :  { %2399 = vadd.xlane.f32.xlu0 %v3896_v61  ;;  %v2405_v49 = vmul.f32 %v3896_v61, %v3896_v61 }
0x10e3   :  { %3168 = vmatprep.subr.bf16.mxu0 %v3167_v5 }
0x10e4   :  { %3170 = vmatpush3.bf16.msra.mxu0 %v3167_v5 }
0x10e5   :  { %2409 = vadd.xlane.f32.xlu1 %v2406_v62  ;;  %3172 = vmatprep.subr.bf16.mxu0 %v3171_v7 }
0x10e6   :  { %2407 = vadd.xlane.f32.xlu0 %v2405_v49 }
0x10e8   :  { %3174 = vmatpush3.bf16.msra.mxu0 %v3171_v7 }
0x10e9   :  { %3176 = vmatprep.subr.bf16.mxu0 %v3175_v46 }
0x10ec   :  { %3178 = vmatpush3.bf16.msra.mxu0 %v3175_v46 }
0x10ed   :  { %3180 = vmatprep.subr.bf16.mxu0 %v3179_v11 }
0x10f0   :  { %3182 = vmatpush3.bf16.msra.mxu0 %v3179_v11 }
0x10f1   :  { %3184 = vmatprep.subr.bf16.mxu0 %v3183_v3 }
0x10f4   :  { %3186 = vmatpush3.bf16.msra.mxu0 %v3183_v3 }
0x10f5   :  { %3188 = vmatprep.subr.bf16.mxu0 %v3187_v16 }
0x10f8   :  { %3190 = vmatpush3.bf16.msra.mxu0 %v3187_v16 }
0x116e   :  { %v2402_v17 = vpop.xlane.xlu1 %2401 }
0x116f   :  { %v2404_v18 = vmul.f32 0.03125, %v2402_v17  ;;  %v2400_v19 = vpop.xlane.xlu0 %2399 }
0x1170   :  { %v2403_v21 = vmul.f32 0.03125, %v2400_v19 }
0x1171   :  { %v2414_v23 = vmul.f32 %v2404_v18, %v2404_v18  ;;  %v2418_v32 = vsub.f32 %v3893_v58, %v2404_v18 }
0x1172   :  { %v2410_v22 = vpop.xlane.xlu1 %2409  ;;  %v2413_v26 = vmul.f32 %v2403_v21, %v2403_v21  ;;  %v2417_v34 = vsub.f32 %v3896_v61, %v2403_v21 }
0x1173   :  { %v2412_v24 = vmul.f32 0.03125, %v2410_v22  ;;  %v2408_v25 = vpop.xlane.xlu0 %2407 }
0x1174   :  { %v2411_v27 = vmul.f32 0.03125, %v2408_v25 }
0x1175   :  { %v2416_v28 = vsub.f32 %v2412_v24, %v2414_v23 }
0x1176   :  { %v2415_v29 = vsub.f32 %v2411_v27, %v2413_v26 }
0x1177   :  { %v2420_v30 = vadd.f32 1e-05, %v2416_v28 }
0x1178   :  { %v2419_v31 = vadd.f32 1e-05, %v2415_v29 }
0x1179   :  { %3259 = vrsqrt.f32 %v2420_v30 }
0x117a   :  { %3261 = vrsqrt.f32 %v2419_v31 }
0x1183   :  { %v3260_v33 = vpop.eup %3259 }
0x1184   :  { %v3262_v35 = vpop.eup %3261  ;;  %v2424_v36 = vmul.f32 %v3260_v33, %v2418_v32 }
0x1185   :  { %v2423_v20 = vmul.f32 %v3262_v35, %v2417_v34 }
0x1186   :  { %v2430_v38 = vmul.f32 %v2428_v40, %v2424_v36 }
0x1187   :  { %v2429_v39 = vmul.f32 %v2428_v40, %v2423_v20 }
0x1188   :  { %v2436_v41 = vadd.f32 %v2434_v37, %v2430_v38 }
0x1189   :  { %v2435_v4 = vadd.f32 %v2434_v37, %v2429_v39 }
0x118b   :  { %2996 = vmatprep.mubr.f32.mxu0 %v2435_v4 }
0x118c   :  { %2997 = vmatmul.mubr.f32.vlgmr.msra.gmra.mrb[12].mxu0 %v2436_v41 }
0x125f   :  { %v2998_v48 = vpop.f32.mrb[12].mxu0 }
0x1260   :  { %v2529_v43 = vadd.f32 %v2998_v48, %v2456_v42  ;;  %v2523_v44 = vpop.f32.mrb[13].mxu0 }
0x1261   :  { %v2524_v52 = vadd.f32 %v2523_v44, %v2456_v42 }
0x1262   :  { %2533 = vst [vmem:[#allocation14 + $0x8] sm:$0xff] %v2529_v43 }
0x1263   :  { %2532 = vst [vmem:[#allocation14] sm:$0xff] %v2524_v52 }
0x1264   :  { %3428 = shalt.err (!%p3425_p4)
}
0x1265   :  { %s3429_s12 = scalar_lea.hbm %s3936_s10, 256 }
0x1266   :  { %p3430_p5 = scmp.ne.s32.totalorder %s3936_s10, %s3429_s12  ;;  %p3433_p6 = scmp.lt.u32.totalorder %s3429_s12, %s3936_s10 }
0x1268   :  { %p3435_p7 = pnand %p3433_p6, %p3430_p5 }
0x126a   :  { %3438 = shalt.err (!%p3435_p7)
}
0x126b   :  { %2545 = dma.vmem_to_hbm [thread:$0]  %s2540_s30, 256, %s3936_s10, [#allocation4], %s3451_s25, %s3451_s25, %s3452_s26  }
0x126c   :  { %3447 = dma.done.wait [#allocation4], 256  }
0x126d   :  { %3448 = vsyncadd [#allocation4], 4294967040 }
0x126e   :  { %2549 = vsyncpa [#allocation3], 1 }
0x126f   :  { %2550 = vsyncpa [#allocation6], 1 }
0x1270   :  { %2551 = vsyncpa [#allocation9], 1 }
0x1271   :  { %2552 = vsyncpa [#allocation12], 1 }
0x1272   :  { %2553 = vsyncpa [#allocation4], 1 }

</bundles_post_ra>
